<compile_context>
chip_gen: v5e
topology: v5e:2x2
jax: 0.10.0
libtpu: 0.0.40
codegen_flags: <defaults>
</compile_context>

<pallas_src>
import jax
import jax.numpy as jnp
from jax.experimental import pallas as pl
from jax.experimental.pallas import tpu as pltpu

H1 = 256          # hidden 1 (nn.Linear(input_dim, 256))
H2_LOGICAL = 64   # hidden 2 (nn.Linear(256, 64))
H2 = 128          # hidden 2 zero-padded to a full 128-lane vreg


def _round_up(x, m):
    return (x + m - 1) // m * m


def _mlp_kernel(x_ref, w1_ref, b1_ref, w2_ref, b2_ref, w3_ref, b3_ref, o_ref):
    """One batch tile of Linear->ReLU->Linear->ReLU->Linear->Sigmoid."""
    # Layer 1: (tile_b, D) @ (D, 256) on the MXU. x arrives bf16 straight from
    # HBM (no in-kernel cast), f32 accumulation; bias + ReLU in f32.
    h1 = jnp.dot(x_ref[...], w1_ref[...], preferred_element_type=jnp.float32)
    h1 = jnp.maximum(h1 + b1_ref[...], 0.0)

    # Layer 2: (tile_b, 256) @ (256, 128) on the MXU (hidden2 zero-padded 64->128).
    h2 = jnp.dot(h1.astype(jnp.bfloat16), w2_ref[...],
                 preferred_element_type=jnp.float32)
    h2 = jnp.maximum(h2 + b2_ref[...], 0.0)

    # Layer 3: 128 -> 1. A single-output-column MXU matvec wastes the systolic
    # array, so do it as a VPU multiply + XLU lane reduction (w3 is a (1, 128)
    # row, b3 an SMEM scalar).
    z = jnp.sum(h2 * w3_ref[...], axis=-1, keepdims=True) + b3_ref[0]
    # Output is only tile_b*4 bytes/step, so the masked (tile_b, 1) column store
    # is free filler; a lane-dense relayout isn't worth it here.
    o_ref[...] = jax.nn.sigmoid(z)


def _vmem_budget_bytes():
    """~75% of this chip's VMEM (96 MiB on v5e/v6e, 48 MiB on v7x)."""
    try:
        cap = int(pltpu.get_tpu_info().vmem_capacity_bytes)
    except Exception:
        cap = 64 * 1024 * 1024   # conservative fallback: v7x per-core VMEM
    return (cap * 3) // 4


def _auto_tile_b(D, vmem_budget, weight_bytes, cap=2048):
    """Largest batch tile (multiple of 8) fitting the VMEM budget."""
    # per-row VMEM: double-buffered bf16 x row + double-buffered f32 out row
    # + f32 h1/h2 intermediates (rough upper bound).
    per_row = 2 * D * 2 + 2 * 4 + (H1 + H2) * 4
    avail = vmem_budget - 2 * weight_bytes - (4 << 20)   # weights + misc headroom
    tile = max(8, min(cap, avail // per_row))
    return int((tile // 8) * 8)


def hallucination_classifier_forward(x, params, *, max_tile_b=None):
    """x: (B, D); returns (B,) float32 sigmoid probabilities.

    The HBM x stream is bf16 (the kernel is memory-bound on it); pass bf16
    directly from the producer, or any other float dtype and it is cast here.
    """
    w1, b1, w2, b2, w3, b3 = params
    B, D = x.shape

    if x.dtype != jnp.bfloat16:
        x = x.astype(jnp.bfloat16)

    weight_bytes = D * H1 * 2 + H1 * H2 * 2 + (H1 + 2 * H2 + 1) * 4
    vmem_limit = _vmem_budget_bytes()

    tile_cap = (_auto_tile_b(D, vmem_limit, weight_bytes)
                if max_tile_b is None else int(max_tile_b))
    tile_b = min(tile_cap, _round_up(B, 8))
    tile_b = max(8, (tile_b // 8) * 8)

    b_pad = _round_up(B, tile_b)
    if b_pad != B:
        x = jnp.pad(x, ((0, b_pad - B), (0, 0)))
    num_tiles = b_pad // tile_b

    flops = 2 * b_pad * (D * H1 + H1 * H2 + H2)
    bytes_accessed = (b_pad * D * 2                    # bf16 x stream
                      + D * H1 * 2 + H1 * H2 * 2       # bf16 weights
                      + (H1 + 2 * H2 + 1) * 4          # f32 biases + w3 row
                      + b_pad * 4)                     # output
    cost = pl.CostEstimate(flops=flops,
                           transcendentals=2 * b_pad,  # sigmoid = exp + recip
                           bytes_accessed=bytes_accessed)

    def build(semantics, weight_bufs):
        if weight_bufs is None:
            def const_spec(shape):
                return pl.BlockSpec(shape, lambda i: (0, 0))
        else:
            mode = pl.Buffered(weight_bufs)

            def const_spec(shape):
                return pl.BlockSpec(shape, lambda i: (0, 0), pipeline_mode=mode)

        return pl.pallas_call(
            _mlp_kernel,
            out_shape=jax.ShapeDtypeStruct((b_pad, 1), jnp.float32),
            grid=(num_tiles,),
            in_specs=[
                # x: streamed per batch tile (auto double-buffered).
                pl.BlockSpec((tile_b, D), lambda i: (i, 0)),
                # Weights / biases: constant index_map -> VMEM-resident.
                const_spec((D, H1)),
                const_spec((1, H1)),
                const_spec((H1, H2)),
                const_spec((1, H2)),
                const_spec((1, H2)),
                # b3: scalar in SMEM (a (1,1) VMEM tile would pad to (8,128)).
                pl.BlockSpec(memory_space=pltpu.SMEM),
            ],
            out_specs=pl.BlockSpec((tile_b, 1), lambda i: (i, 0)),
            compiler_params=pltpu.CompilerParams(
                dimension_semantics=semantics,
                vmem_limit_bytes=vmem_limit),
            cost_estimate=cost,
        )

    # Config ladder: most aggressive first, degrade gracefully so the kernel
    # always compiles (CORE_PARALLEL engages both v7x TCs; Buffered(1) weights
    # saves one w1 copy of VMEM).
    configs = []
    core_parallel = getattr(pltpu, "CORE_PARALLEL", None)
    has_buffered = hasattr(pl, "Buffered")
    if core_parallel is not None and has_buffered:
        configs.append(((core_parallel,), 1))
    if has_buffered:
        configs.append((("parallel",), 1))
    configs.append((("parallel",), None))

    out, last_err = None, None
    for semantics, weight_bufs in configs:
        try:
            out = jax.block_until_ready(
                build(semantics, weight_bufs)(x, w1, b1, w2, b2, w3, b3))
            break
        except Exception as e:   # fall back to the next (safer) config
            last_err = e
    if out is None:
        raise last_err

    return out[:B, 0]   # drop batch padding + squeeze(-1)


def init_params(key, input_dim):
    """Xavier-uniform weights (nn.init.xavier_uniform_), zero biases.

    Weights stored transposed vs. PyTorch ((in, out) instead of (out, in)); w1/w2
    kept in bf16; hidden2 zero-padded 64->128 (numerically identical model).
    """
    k1, k2, k3 = jax.random.split(key, 3)

    def xavier(k, fan_in, fan_out):
        bound = (6.0 / (fan_in + fan_out)) ** 0.5
        return jax.random.uniform(k, (fan_in, fan_out), jnp.float32, -bound, bound)

    w1 = xavier(k1, input_dim, H1).astype(jnp.bfloat16)                    # (D, 256)
    b1 = jnp.zeros((1, H1), jnp.float32)

    w2 = xavier(k2, H1, H2_LOGICAL)                                        # (256, 64)
    w2 = jnp.pad(w2, ((0, 0), (0, H2 - H2_LOGICAL))).astype(jnp.bfloat16)  # (256, 128)
    b2 = jnp.zeros((1, H2), jnp.float32)

    w3 = xavier(k3, H2_LOGICAL, 1).reshape(1, H2_LOGICAL)                  # (1, 64) row
    w3 = jnp.pad(w3, ((0, 0), (0, H2 - H2_LOGICAL)))                       # (1, 128) f32
    b3 = jnp.zeros((1,), jnp.float32)

    return (w1, b1, w2, b2, w3, b3)


def _reference_forward(x, params):
    """Pure-JAX reference with the same bf16 operand rounding as the kernel."""
    w1, b1, w2, b2, w3, b3 = params
    hp = jax.lax.Precision.HIGHEST
    xb = x.astype(jnp.bfloat16).astype(jnp.float32)
    h1 = jnp.maximum(jnp.dot(xb, w1.astype(jnp.float32), precision=hp) + b1, 0.0)
    h1b = h1.astype(jnp.bfloat16).astype(jnp.float32)
    h2 = jnp.maximum(jnp.dot(h1b, w2.astype(jnp.float32), precision=hp) + b2, 0.0)
    z = jnp.sum(h2 * w3, axis=-1) + b3[0]
    return jax.nn.sigmoid(z)


if __name__ == "__main__":
    key = jax.random.PRNGKey(0)
    k_x, k_p = jax.random.split(key)

    # Small demo shapes (input_dim is a constructor arg; PyTorch default is 4096).
    batch, input_dim = 40, 256
    x = jax.random.normal(k_x, (batch, input_dim), dtype=jnp.float32)
    params = init_params(k_p, input_dim)

    # Producer emits bf16 (the kernel's HBM x stream is bf16); max_tile_b=16 so
    # the demo exercises a multi-step grid + ragged tail padding.
    y = hallucination_classifier_forward(x.astype(jnp.bfloat16), params,
                                         max_tile_b=16)
    y = jax.block_until_ready(y)

    assert y.shape == (batch,)
    assert bool(jnp.all((y >= 0.0) & (y <= 1.0)))
    y_ref = _reference_forward(x, params)
    max_err = float(jnp.max(jnp.abs(y - y_ref)))
    assert max_err < 2e-3, max_err
    print("KERNEL_OK")
</pallas_src>

<mosaic_0001>
module attributes {stable_mosaic.version = 11 : i64} {
  func.func @_mlp_kernel(%arg0: i32, %arg1: memref<16x256xbf16, #tpu.memory_space<vmem>>, %arg2: memref<256x256xbf16, #tpu.memory_space<vmem>>, %arg3: memref<1x256xf32, #tpu.memory_space<vmem>>, %arg4: memref<256x128xbf16, #tpu.memory_space<vmem>>, %arg5: memref<1x128xf32, #tpu.memory_space<vmem>>, %arg6: memref<1x128xf32, #tpu.memory_space<vmem>>, %arg7: memref<1xf32, #tpu.memory_space<smem>>, %arg8: memref<16x1xf32, #tpu.memory_space<vmem>>) attributes {dimension_semantics = [#tpu.dimension_semantics<core_parallel>], iteration_bounds = array<i64: 3>, scalar_prefetch = 0 : i64, scratch_operands = 0 : i64, tpu.core_type = #tpu.core_type<tc>, window_params = [{transform_indices = @transform_0, window_bounds = array<i64: 16, 256>}, {pipeline_mode = #tpu.pipeline_mode<synchronous>, transform_indices = @transform_1, window_bounds = array<i64: 256, 256>}, {pipeline_mode = #tpu.pipeline_mode<synchronous>, transform_indices = @transform_2, window_bounds = array<i64: 1, 256>}, {pipeline_mode = #tpu.pipeline_mode<synchronous>, transform_indices = @transform_3, window_bounds = array<i64: 256, 128>}, {pipeline_mode = #tpu.pipeline_mode<synchronous>, transform_indices = @transform_4, window_bounds = array<i64: 1, 128>}, {pipeline_mode = #tpu.pipeline_mode<synchronous>, transform_indices = @transform_5, window_bounds = array<i64: 1, 128>}, {transform_indices = @transform_6, window_bounds = array<i64: 1>}, {transform_indices = @transform_7, window_bounds = array<i64: 16, 1>}]} {
    %c0 = arith.constant 0 : index
    %c0_0 = arith.constant 0 : index
    %0 = vector.load %arg1[%c0, %c0_0] : memref<16x256xbf16, #tpu.memory_space<vmem>>, vector<16x256xbf16>
    %c0_1 = arith.constant 0 : index
    %c0_2 = arith.constant 0 : index
    %1 = vector.load %arg2[%c0_1, %c0_2] : memref<256x256xbf16, #tpu.memory_space<vmem>>, vector<256x256xbf16>
    %cst = arith.constant dense<0.000000e+00> : vector<16x256xf32>
    %2 = tpu.matmul %0, %1, %cst {dimension_numbers = #tpu.dot_dimension_numbers<[1], [0], [0], [1], [0, 0, 1, 1], [], []>} : vector<16x256xbf16>, vector<256x256xbf16>, vector<16x256xf32> -> vector<16x256xf32>
    %c0_3 = arith.constant 0 : index
    %c0_4 = arith.constant 0 : index
    %3 = vector.load %arg3[%c0_3, %c0_4] : memref<1x256xf32, #tpu.memory_space<vmem>>, vector<1x256xf32>
    %4 = vector.broadcast %3 : vector<1x256xf32> to vector<16x256xf32>
    %5 = arith.addf %2, %4 : vector<16x256xf32>
    %cst_5 = arith.constant 0.000000e+00 : f32
    %6 = vector.broadcast %cst_5 : f32 to vector<16x256xf32>
    %7 = arith.maximumf %5, %6 : vector<16x256xf32>
    %8 = arith.truncf %7 : vector<16x256xf32> to vector<16x256xbf16>
    %c0_6 = arith.constant 0 : index
    %c0_7 = arith.constant 0 : index
    %9 = vector.load %arg4[%c0_6, %c0_7] : memref<256x128xbf16, #tpu.memory_space<vmem>>, vector<256x128xbf16>
    %cst_8 = arith.constant dense<0.000000e+00> : vector<16x128xf32>
    %10 = tpu.matmul %8, %9, %cst_8 {dimension_numbers = #tpu.dot_dimension_numbers<[1], [0], [0], [1], [0, 0, 1, 1], [], []>} : vector<16x256xbf16>, vector<256x128xbf16>, vector<16x128xf32> -> vector<16x128xf32>
    %c0_9 = arith.constant 0 : index
    %c0_10 = arith.constant 0 : index
    %11 = vector.load %arg5[%c0_9, %c0_10] : memref<1x128xf32, #tpu.memory_space<vmem>>, vector<1x128xf32>
    %12 = vector.broadcast %11 : vector<1x128xf32> to vector<16x128xf32>
    %13 = arith.addf %10, %12 : vector<16x128xf32>
    %cst_11 = arith.constant 0.000000e+00 : f32
    %14 = vector.broadcast %cst_11 : f32 to vector<16x128xf32>
    %15 = arith.maximumf %13, %14 : vector<16x128xf32>
    %c0_12 = arith.constant 0 : index
    %c0_13 = arith.constant 0 : index
    %16 = vector.load %arg6[%c0_12, %c0_13] : memref<1x128xf32, #tpu.memory_space<vmem>>, vector<1x128xf32>
    %17 = vector.broadcast %16 : vector<1x128xf32> to vector<16x128xf32>
    %18 = arith.mulf %15, %17 : vector<16x128xf32>
    %cst_14 = arith.constant dense<0.000000e+00> : vector<16xf32>
    %19 = vector.multi_reduction <add>, %18, %cst_14 [1] : vector<16x128xf32> to vector<16xf32>
    %20 = vector.shape_cast %19 : vector<16xf32> to vector<16x1xf32>
    %c0_15 = arith.constant 0 : index
    %21 = memref.load %arg7[%c0_15] : memref<1xf32, #tpu.memory_space<smem>>
    %22 = vector.broadcast %21 : f32 to vector<16x1xf32>
    %23 = arith.addf %20, %22 : vector<16x1xf32>
    %24 = arith.negf %23 : vector<16x1xf32>
    %25 = math.exp %24 : vector<16x1xf32>
    %cst_16 = arith.constant 1.000000e+00 : f32
    %26 = vector.broadcast %cst_16 : f32 to vector<16x1xf32>
    %27 = arith.addf %26, %25 : vector<16x1xf32>
    %28 = arith.divf %26, %27 : vector<16x1xf32>
    %c0_17 = arith.constant 0 : index
    %c0_18 = arith.constant 0 : index
    %29 = vector.load %arg8[%c0_17, %c0_18] : memref<16x1xf32, #tpu.memory_space<vmem>>, vector<16x1xf32>
    tpu.vector_store %arg8[%c0_17, %c0_18], %28 {strides = array<i32>} : memref<16x1xf32, #tpu.memory_space<vmem>>, vector<16x1xf32>,
    return
  }
  func.func @transform_0(%arg0: i32) -> (i32, i32) {
    %c0_i32 = arith.constant 0 : i32
    %c0_i32_0 = arith.constant 0 : i32
    return %arg0, %c0_i32 : i32, i32
  }
  func.func @transform_1(%arg0: i32) -> (i32, i32) {
    %c0_i32 = arith.constant 0 : i32
    %c0_i32_0 = arith.constant 0 : i32
    %c0_i32_1 = arith.constant 0 : i32
    return %c0_i32, %c0_i32_0 : i32, i32
  }
  func.func @transform_2(%arg0: i32) -> (i32, i32) {
    %c0_i32 = arith.constant 0 : i32
    %c0_i32_0 = arith.constant 0 : i32
    %c0_i32_1 = arith.constant 0 : i32
    return %c0_i32, %c0_i32_0 : i32, i32
  }
  func.func @transform_3(%arg0: i32) -> (i32, i32) {
    %c0_i32 = arith.constant 0 : i32
    %c0_i32_0 = arith.constant 0 : i32
    %c0_i32_1 = arith.constant 0 : i32
    return %c0_i32, %c0_i32_0 : i32, i32
  }
  func.func @transform_4(%arg0: i32) -> (i32, i32) {
    %c0_i32 = arith.constant 0 : i32
    %c0_i32_0 = arith.constant 0 : i32
    %c0_i32_1 = arith.constant 0 : i32
    return %c0_i32, %c0_i32_0 : i32, i32
  }
  func.func @transform_5(%arg0: i32) -> (i32, i32) {
    %c0_i32 = arith.constant 0 : i32
    %c0_i32_0 = arith.constant 0 : i32
    %c0_i32_1 = arith.constant 0 : i32
    return %c0_i32, %c0_i32_0 : i32, i32
  }
  func.func @transform_6(%arg0: i32) -> i32 {
    %c0_i32 = arith.constant 0 : i32
    %c0_i32_0 = arith.constant 0 : i32
    return %c0_i32 : i32
  }
  func.func @transform_7(%arg0: i32) -> (i32, i32) {
    %c0_i32 = arith.constant 0 : i32
    %c0_i32_0 = arith.constant 0 : i32
    return %arg0, %c0_i32 : i32, i32
  }
}

module attributes {stable_mosaic.version = 11 : i64} {
  func.func @_mlp_kernel(%arg0: i32, %arg1: memref<16x256xbf16, #tpu.memory_space<vmem>>, %arg2: memref<256x256xbf16, #tpu.memory_space<vmem>>, %arg3: memref<1x256xf32, #tpu.memory_space<vmem>>, %arg4: memref<256x128xbf16, #tpu.memory_space<vmem>>, %arg5: memref<1x128xf32, #tpu.memory_space<vmem>>, %arg6: memref<1x128xf32, #tpu.memory_space<vmem>>, %arg7: memref<1xf32, #tpu.memory_space<smem>>, %arg8: memref<16x1xf32, #tpu.memory_space<vmem>>) attributes {dimension_semantics = [#tpu.dimension_semantics<parallel>], iteration_bounds = array<i64: 3>, scalar_prefetch = 0 : i64, scratch_operands = 0 : i64, tpu.core_type = #tpu.core_type<tc>, window_params = [{transform_indices = @transform_0, window_bounds = array<i64: 16, 256>}, {pipeline_mode = #tpu.pipeline_mode<synchronous>, transform_indices = @transform_1, window_bounds = array<i64: 256, 256>}, {pipeline_mode = #tpu.pipeline_mode<synchronous>, transform_indices = @transform_2, window_bounds = array<i64: 1, 256>}, {pipeline_mode = #tpu.pipeline_mode<synchronous>, transform_indices = @transform_3, window_bounds = array<i64: 256, 128>}, {pipeline_mode = #tpu.pipeline_mode<synchronous>, transform_indices = @transform_4, window_bounds = array<i64: 1, 128>}, {pipeline_mode = #tpu.pipeline_mode<synchronous>, transform_indices = @transform_5, window_bounds = array<i64: 1, 128>}, {transform_indices = @transform_6, window_bounds = array<i64: 1>}, {transform_indices = @transform_7, window_bounds = array<i64: 16, 1>}]} {
    %c0 = arith.constant 0 : index
    %c0_0 = arith.constant 0 : index
    %0 = vector.load %arg1[%c0, %c0_0] : memref<16x256xbf16, #tpu.memory_space<vmem>>, vector<16x256xbf16>
    %c0_1 = arith.constant 0 : index
    %c0_2 = arith.constant 0 : index
    %1 = vector.load %arg2[%c0_1, %c0_2] : memref<256x256xbf16, #tpu.memory_space<vmem>>, vector<256x256xbf16>
    %cst = arith.constant dense<0.000000e+00> : vector<16x256xf32>
    %2 = tpu.matmul %0, %1, %cst {dimension_numbers = #tpu.dot_dimension_numbers<[1], [0], [0], [1], [0, 0, 1, 1], [], []>} : vector<16x256xbf16>, vector<256x256xbf16>, vector<16x256xf32> -> vector<16x256xf32>
    %c0_3 = arith.constant 0 : index
    %c0_4 = arith.constant 0 : index
    %3 = vector.load %arg3[%c0_3, %c0_4] : memref<1x256xf32, #tpu.memory_space<vmem>>, vector<1x256xf32>
    %4 = vector.broadcast %3 : vector<1x256xf32> to vector<16x256xf32>
    %5 = arith.addf %2, %4 : vector<16x256xf32>
    %cst_5 = arith.constant 0.000000e+00 : f32
    %6 = vector.broadcast %cst_5 : f32 to vector<16x256xf32>
    %7 = arith.maximumf %5, %6 : vector<16x256xf32>
    %8 = arith.truncf %7 : vector<16x256xf32> to vector<16x256xbf16>
    %c0_6 = arith.constant 0 : index
    %c0_7 = arith.constant 0 : index
    %9 = vector.load %arg4[%c0_6, %c0_7] : memref<256x128xbf16, #tpu.memory_space<vmem>>, vector<256x128xbf16>
    %cst_8 = arith.constant dense<0.000000e+00> : vector<16x128xf32>
    %10 = tpu.matmul %8, %9, %cst_8 {dimension_numbers = #tpu.dot_dimension_numbers<[1], [0], [0], [1], [0, 0, 1, 1], [], []>} : vector<16x256xbf16>, vector<256x128xbf16>, vector<16x128xf32> -> vector<16x128xf32>
    %c0_9 = arith.constant 0 : index
    %c0_10 = arith.constant 0 : index
    %11 = vector.load %arg5[%c0_9, %c0_10] : memref<1x128xf32, #tpu.memory_space<vmem>>, vector<1x128xf32>
    %12 = vector.broadcast %11 : vector<1x128xf32> to vector<16x128xf32>
    %13 = arith.addf %10, %12 : vector<16x128xf32>
    %cst_11 = arith.constant 0.000000e+00 : f32
    %14 = vector.broadcast %cst_11 : f32 to vector<16x128xf32>
    %15 = arith.maximumf %13, %14 : vector<16x128xf32>
    %c0_12 = arith.constant 0 : index
    %c0_13 = arith.constant 0 : index
    %16 = vector.load %arg6[%c0_12, %c0_13] : memref<1x128xf32, #tpu.memory_space<vmem>>, vector<1x128xf32>
    %17 = vector.broadcast %16 : vector<1x128xf32> to vector<16x128xf32>
    %18 = arith.mulf %15, %17 : vector<16x128xf32>
    %cst_14 = arith.constant dense<0.000000e+00> : vector<16xf32>
    %19 = vector.multi_reduction <add>, %18, %cst_14 [1] : vector<16x128xf32> to vector<16xf32>
    %20 = vector.shape_cast %19 : vector<16xf32> to vector<16x1xf32>
    %c0_15 = arith.constant 0 : index
    %21 = memref.load %arg7[%c0_15] : memref<1xf32, #tpu.memory_space<smem>>
    %22 = vector.broadcast %21 : f32 to vector<16x1xf32>
    %23 = arith.addf %20, %22 : vector<16x1xf32>
    %24 = arith.negf %23 : vector<16x1xf32>
    %25 = math.exp %24 : vector<16x1xf32>
    %cst_16 = arith.constant 1.000000e+00 : f32
    %26 = vector.broadcast %cst_16 : f32 to vector<16x1xf32>
    %27 = arith.addf %26, %25 : vector<16x1xf32>
    %28 = arith.divf %26, %27 : vector<16x1xf32>
    %c0_17 = arith.constant 0 : index
    %c0_18 = arith.constant 0 : index
    %29 = vector.load %arg8[%c0_17, %c0_18] : memref<16x1xf32, #tpu.memory_space<vmem>>, vector<16x1xf32>
    tpu.vector_store %arg8[%c0_17, %c0_18], %28 {strides = array<i32>} : memref<16x1xf32, #tpu.memory_space<vmem>>, vector<16x1xf32>,
    return
  }
  func.func @transform_0(%arg0: i32) -> (i32, i32) {
    %c0_i32 = arith.constant 0 : i32
    %c0_i32_0 = arith.constant 0 : i32
    return %arg0, %c0_i32 : i32, i32
  }
  func.func @transform_1(%arg0: i32) -> (i32, i32) {
    %c0_i32 = arith.constant 0 : i32
    %c0_i32_0 = arith.constant 0 : i32
    %c0_i32_1 = arith.constant 0 : i32
    return %c0_i32, %c0_i32_0 : i32, i32
  }
  func.func @transform_2(%arg0: i32) -> (i32, i32) {
    %c0_i32 = arith.constant 0 : i32
    %c0_i32_0 = arith.constant 0 : i32
    %c0_i32_1 = arith.constant 0 : i32
    return %c0_i32, %c0_i32_0 : i32, i32
  }
  func.func @transform_3(%arg0: i32) -> (i32, i32) {
    %c0_i32 = arith.constant 0 : i32
    %c0_i32_0 = arith.constant 0 : i32
    %c0_i32_1 = arith.constant 0 : i32
    return %c0_i32, %c0_i32_0 : i32, i32
  }
  func.func @transform_4(%arg0: i32) -> (i32, i32) {
    %c0_i32 = arith.constant 0 : i32
    %c0_i32_0 = arith.constant 0 : i32
    %c0_i32_1 = arith.constant 0 : i32
    return %c0_i32, %c0_i32_0 : i32, i32
  }
  func.func @transform_5(%arg0: i32) -> (i32, i32) {
    %c0_i32 = arith.constant 0 : i32
    %c0_i32_0 = arith.constant 0 : i32
    %c0_i32_1 = arith.constant 0 : i32
    return %c0_i32, %c0_i32_0 : i32, i32
  }
  func.func @transform_6(%arg0: i32) -> i32 {
    %c0_i32 = arith.constant 0 : i32
    %c0_i32_0 = arith.constant 0 : i32
    return %c0_i32 : i32
  }
  func.func @transform_7(%arg0: i32) -> (i32, i32) {
    %c0_i32 = arith.constant 0 : i32
    %c0_i32_0 = arith.constant 0 : i32
    return %arg0, %c0_i32 : i32, i32
  }
}

module attributes {stable_mosaic.version = 11 : i64} {
  func.func @_mlp_kernel(%arg0: i32, %arg1: memref<16x256xbf16, #tpu.memory_space<vmem>>, %arg2: memref<256x256xbf16, #tpu.memory_space<vmem>>, %arg3: memref<1x256xf32, #tpu.memory_space<vmem>>, %arg4: memref<256x128xbf16, #tpu.memory_space<vmem>>, %arg5: memref<1x128xf32, #tpu.memory_space<vmem>>, %arg6: memref<1x128xf32, #tpu.memory_space<vmem>>, %arg7: memref<1xf32, #tpu.memory_space<smem>>, %arg8: memref<16x1xf32, #tpu.memory_space<vmem>>) attributes {dimension_semantics = [#tpu.dimension_semantics<parallel>], iteration_bounds = array<i64: 3>, scalar_prefetch = 0 : i64, scratch_operands = 0 : i64, tpu.core_type = #tpu.core_type<tc>, window_params = [{transform_indices = @transform_0, window_bounds = array<i64: 16, 256>}, {pipeline_mode = #tpu.pipeline_mode<synchronous>, transform_indices = @transform_1, window_bounds = array<i64: 256, 256>}, {pipeline_mode = #tpu.pipeline_mode<synchronous>, transform_indices = @transform_2, window_bounds = array<i64: 1, 256>}, {pipeline_mode = #tpu.pipeline_mode<synchronous>, transform_indices = @transform_3, window_bounds = array<i64: 256, 128>}, {pipeline_mode = #tpu.pipeline_mode<synchronous>, transform_indices = @transform_4, window_bounds = array<i64: 1, 128>}, {pipeline_mode = #tpu.pipeline_mode<synchronous>, transform_indices = @transform_5, window_bounds = array<i64: 1, 128>}, {transform_indices = @transform_6, window_bounds = array<i64: 1>}, {transform_indices = @transform_7, window_bounds = array<i64: 16, 1>}]} {
    %c0 = arith.constant 0 : index
    %c0_0 = arith.constant 0 : index
    %0 = vector.load %arg1[%c0, %c0_0] : memref<16x256xbf16, #tpu.memory_space<vmem>>, vector<16x256xbf16>
    %c0_1 = arith.constant 0 : index
    %c0_2 = arith.constant 0 : index
    %1 = vector.load %arg2[%c0_1, %c0_2] : memref<256x256xbf16, #tpu.memory_space<vmem>>, vector<256x256xbf16>
    %cst = arith.constant dense<0.000000e+00> : vector<16x256xf32>
    %2 = tpu.matmul %0, %1, %cst {dimension_numbers = #tpu.dot_dimension_numbers<[1], [0], [0], [1], [0, 0, 1, 1], [], []>} : vector<16x256xbf16>, vector<256x256xbf16>, vector<16x256xf32> -> vector<16x256xf32>
    %c0_3 = arith.constant 0 : index
    %c0_4 = arith.constant 0 : index
    %3 = vector.load %arg3[%c0_3, %c0_4] : memref<1x256xf32, #tpu.memory_space<vmem>>, vector<1x256xf32>
    %4 = vector.broadcast %3 : vector<1x256xf32> to vector<16x256xf32>
    %5 = arith.addf %2, %4 : vector<16x256xf32>
    %cst_5 = arith.constant 0.000000e+00 : f32
    %6 = vector.broadcast %cst_5 : f32 to vector<16x256xf32>
    %7 = arith.maximumf %5, %6 : vector<16x256xf32>
    %8 = arith.truncf %7 : vector<16x256xf32> to vector<16x256xbf16>
    %c0_6 = arith.constant 0 : index
    %c0_7 = arith.constant 0 : index
    %9 = vector.load %arg4[%c0_6, %c0_7] : memref<256x128xbf16, #tpu.memory_space<vmem>>, vector<256x128xbf16>
    %cst_8 = arith.constant dense<0.000000e+00> : vector<16x128xf32>
    %10 = tpu.matmul %8, %9, %cst_8 {dimension_numbers = #tpu.dot_dimension_numbers<[1], [0], [0], [1], [0, 0, 1, 1], [], []>} : vector<16x256xbf16>, vector<256x128xbf16>, vector<16x128xf32> -> vector<16x128xf32>
    %c0_9 = arith.constant 0 : index
    %c0_10 = arith.constant 0 : index
    %11 = vector.load %arg5[%c0_9, %c0_10] : memref<1x128xf32, #tpu.memory_space<vmem>>, vector<1x128xf32>
    %12 = vector.broadcast %11 : vector<1x128xf32> to vector<16x128xf32>
    %13 = arith.addf %10, %12 : vector<16x128xf32>
    %cst_11 = arith.constant 0.000000e+00 : f32
    %14 = vector.broadcast %cst_11 : f32 to vector<16x128xf32>
    %15 = arith.maximumf %13, %14 : vector<16x128xf32>
    %c0_12 = arith.constant 0 : index
    %c0_13 = arith.constant 0 : index
    %16 = vector.load %arg6[%c0_12, %c0_13] : memref<1x128xf32, #tpu.memory_space<vmem>>, vector<1x128xf32>
    %17 = vector.broadcast %16 : vector<1x128xf32> to vector<16x128xf32>
    %18 = arith.mulf %15, %17 : vector<16x128xf32>
    %cst_14 = arith.constant dense<0.000000e+00> : vector<16xf32>
    %19 = vector.multi_reduction <add>, %18, %cst_14 [1] : vector<16x128xf32> to vector<16xf32>
    %20 = vector.shape_cast %19 : vector<16xf32> to vector<16x1xf32>
    %c0_15 = arith.constant 0 : index
    %21 = memref.load %arg7[%c0_15] : memref<1xf32, #tpu.memory_space<smem>>
    %22 = vector.broadcast %21 : f32 to vector<16x1xf32>
    %23 = arith.addf %20, %22 : vector<16x1xf32>
    %24 = arith.negf %23 : vector<16x1xf32>
    %25 = math.exp %24 : vector<16x1xf32>
    %cst_16 = arith.constant 1.000000e+00 : f32
    %26 = vector.broadcast %cst_16 : f32 to vector<16x1xf32>
    %27 = arith.addf %26, %25 : vector<16x1xf32>
    %28 = arith.divf %26, %27 : vector<16x1xf32>
    %c0_17 = arith.constant 0 : index
    %c0_18 = arith.constant 0 : index
    %29 = vector.load %arg8[%c0_17, %c0_18] : memref<16x1xf32, #tpu.memory_space<vmem>>, vector<16x1xf32>
    tpu.vector_store %arg8[%c0_17, %c0_18], %28 {strides = array<i32>} : memref<16x1xf32, #tpu.memory_space<vmem>>, vector<16x1xf32>,
    return
  }
  func.func @transform_0(%arg0: i32) -> (i32, i32) {
    %c0_i32 = arith.constant 0 : i32
    %c0_i32_0 = arith.constant 0 : i32
    return %arg0, %c0_i32 : i32, i32
  }
  func.func @transform_1(%arg0: i32) -> (i32, i32) {
    %c0_i32 = arith.constant 0 : i32
    %c0_i32_0 = arith.constant 0 : i32
    %c0_i32_1 = arith.constant 0 : i32
    return %c0_i32, %c0_i32_0 : i32, i32
  }
  func.func @transform_2(%arg0: i32) -> (i32, i32) {
    %c0_i32 = arith.constant 0 : i32
    %c0_i32_0 = arith.constant 0 : i32
    %c0_i32_1 = arith.constant 0 : i32
    return %c0_i32, %c0_i32_0 : i32, i32
  }
  func.func @transform_3(%arg0: i32) -> (i32, i32) {
    %c0_i32 = arith.constant 0 : i32
    %c0_i32_0 = arith.constant 0 : i32
    %c0_i32_1 = arith.constant 0 : i32
    return %c0_i32, %c0_i32_0 : i32, i32
  }
  func.func @transform_4(%arg0: i32) -> (i32, i32) {
    %c0_i32 = arith.constant 0 : i32
    %c0_i32_0 = arith.constant 0 : i32
    %c0_i32_1 = arith.constant 0 : i32
    return %c0_i32, %c0_i32_0 : i32, i32
  }
  func.func @transform_5(%arg0: i32) -> (i32, i32) {
    %c0_i32 = arith.constant 0 : i32
    %c0_i32_0 = arith.constant 0 : i32
    %c0_i32_1 = arith.constant 0 : i32
    return %c0_i32, %c0_i32_0 : i32, i32
  }
  func.func @transform_6(%arg0: i32) -> i32 {
    %c0_i32 = arith.constant 0 : i32
    %c0_i32_0 = arith.constant 0 : i32
    return %c0_i32 : i32
  }
  func.func @transform_7(%arg0: i32) -> (i32, i32) {
    %c0_i32 = arith.constant 0 : i32
    %c0_i32_0 = arith.constant 0 : i32
    return %arg0, %c0_i32 : i32, i32
  }
}

</mosaic_0001>

<bundles_post_ra>
// kernel: tpu_custom_call.1
= control target key start
LH: loop header
LB: loop body
LE: loop exit
PB: predicated region body
PF: predicated region fallthrough
CT: control target
= control target key end

     0   :  { %s1570_s0 = inlined_call_operand.hbm [shape: bf16[48,256], index: 0, kind: input, shape index: {}]   ;;  %s1571_s1 = inlined_call_operand.hbm [shape: bf16[256,256], index: 1, kind: input, shape index: {}]   ;;  %s1572_s2 = inlined_call_operand.vmem [shape: f32[1,256], index: 2, kind: input, shape index: {}]   ;;  %s1573_s3 = inlined_call_operand.hbm [shape: bf16[256,128], index: 3, kind: input, shape index: {}]   ;;  %s1574_s4 = inlined_call_operand.vmem [shape: f32[1,128], index: 4, kind: input, shape index: {}]   ;;  %s1575_s5 = inlined_call_operand.vmem [shape: f32[1,128], index: 5, kind: input, shape index: {}]   ;;  %s1576_s6 = inlined_call_operand.<no memory space> [shape: f32[1], index: 6, kind: input, shape index: {}]   ;;  %s1577_s7 = inlined_call_operand.vmem [shape: f32[48,1], index: 7, kind: output, shape index: {}]  }
   0x1   :  { %12 = sst [smem:[#allocation2]] %s1576_s6 }
   0x2   :  { %13 = vsyncpa [#allocation4], 0 }
   0x3   :  { %15 = vsyncpa [#allocation4 + $0x1], 0 }
   0x4   :  { %16 = vsyncpa [#allocation6], 0  ;;  %s1438_s26 = smov 0   ;;  %s1440_s27 = smov 0  }
   0x5   :  { %s1442_s28 = smov 0   ;;  %s1444_s29 = smov 0  }
   0x6 LB: > { %s913_s6 = sadd.s32 4294967295, %s1387_s29   ;;  %p42_p0 = scmp.ne.s32.totalorder %s1379_s27, %s1375_s26  ;;  %s1387_s29 = sphi %s1444_s29, %s1585_s29   ;;  %s1383_s28 = sphi %s1442_s28, %s1584_s28   ;;  %s1379_s27 = sphi %s1440_s27, %s1583_s27   ;;  %s1375_s26 = sphi %s1438_s26, %s1582_s26  }
   0x7   : > { %p1460_p1 = scmp.eq.s32.totalorder %s913_s6, 0  ;;  %p915_p2 = scmp.ge.s32.totalorder %s1387_s29, 1 }
   0x8   : > { %p205_p3 = scmp.lt.s32.totalorder %s1387_s29, 4  ;;  %s216_s11 = sshll.u32 %s1571_s1, 4  ;;  %s217_s11 = int_to_ptr.hbm [resolvable:$true] %s216_s11 }
   0x9   : > { %p1468_p4 = por %p1460_p1, %p42_p0  ;;  %s1389_s13 = smov [#allocation5]  }
   0xa   : > { %p1475_p5 = pnand %p915_p2, %p205_p3  ;;  %s218_s14 = sshll.u32 %s1389_s13, 4  ;;  %s219_s14 = int_to_ptr.vmem [resolvable:$true] %s218_s14 }
   0xb   : > { %s233_s17 = sshll.u32 %s1573_s3, 4  ;;  %s1390_s18 = smov 128   ;;  %s234_s17 = int_to_ptr.hbm [resolvable:$true] %s233_s17 }
   0xc   : > { %p1195_p6 = pneg %p1475_p5  ;;  %s1391_s19 = smov 8  }
   0xd   : > { %s1392_s20 = smov [#allocation7]   ;;  %s1393_s22 = smov 64  }
   0xe   : > { %p1196_p7 = pnand %p1195_p6, %p1460_p1  ;;  %s235_s21 = sshll.u32 %s1392_s20, 4  ;;  %s236_s21 = int_to_ptr.vmem [resolvable:$true] %s235_s21 }
   0xf   : > { %s1394_s23 = smov 4   ;;  %s1490_s24 = sadd.s32 1, %s1387_s29  }
  0x10   : > { %1198 = dma.hbm_to_vmem [thread:$0]  (!%p1196_p7), %s217_s11, 4096, %s219_s14, [#allocation6], %s1390_s18, %s1390_s18, %s1391_s19  }
  0x11   : > { %1201 = dma.hbm_to_vmem [thread:$0]  (!%p1196_p7), %s234_s17, 2048, %s236_s21, [#allocation6], %s1393_s22, %s1393_s22, %s1394_s23  }
  0x12   : > { %s26_s25 = ssub.s32 %s1387_s29, %s1490_s24  ;;  %s29_s26 = sadd.s32 1, %s1383_s28 }
  0x13   : > { %p27_p8 = scmp.eq.s32.totalorder %s26_s25, 0  ;;  %p36_p9 = scmp.ne.s32.totalorder %s1383_s28, %s1379_s27 }
  0x14   : > { %p37_p10 = scmp.eq.s32.totalorder %s1387_s29, 0  ;;  %s258_s10 = sand.u32 1, %s1383_s28  }
  0x15   : > { %s1499_s9 = scalar_select %p27_p8, %s1383_s28, %s29_s26  }
  0x16   : > { %p38_p11 = por %p37_p10, %p36_p9  ;;  %s1134_s11 = sshll.u32 %s1387_s29, 4 }
  0x17   : > { %p1208_p12 = scmp.lt.s32.totalorder %s1387_s29, 3  ;;  %s919_s13 = sshll.u32 %s258_s10, 4 }
  0x18   : > { %s268_s16 = scalar_lea.hbm %s1570_s0, %s1134_s11  ;;  %s262_s20 = scalar_lea.vmem [#allocation3], %s919_s13 }
  0x19   : > { %s269_s17 = sshll.u32 %s268_s16, 4  ;;  %s271_s21 = sshll.u32 %s262_s20, 4  ;;  %s270_s17 = int_to_ptr.hbm [resolvable:$true] %s269_s17  ;;  %s272_s21 = int_to_ptr.vmem [resolvable:$true] %s271_s21 }
  0x1a   : > { %p1507_p13 = pnand %p1208_p12, %p38_p11  ;;  %s259_s23 = scalar_lea.sflag [#allocation4], %s258_s10 }
  0x1b   : > { %s1319_s25 = sshra.s32 %s270_s17, 4  ;;  %s1326_s13 = scalar_lea.hbm %s1570_s0, 48  ;;  %s1320_s25 = int_to_ptr.hbm [resolvable:$true] %s1319_s25 }
  0x1c   : > { %s1321_s26 = scalar_lea.hbm %s1320_s25, 16  ;;  %p1323_p2 = pneg %p1507_p13 }
  0x1d   : > { %p1322_p0 = scmp.ne.s32.totalorder %s1320_s25, %s1321_s26  ;;  %p1327_p7 = scmp.lt.s32.totalorder %s1320_s25, %s1570_s0 }
  0x1e   : > { %p1328_p8 = scmp.lt.s32.totalorder %s1326_s13, %s1321_s26 }
  0x1f   : > { %p1324_p3 = pnand %p1323_p2, %p1322_p0 }
  0x20   : > { %p1329_p9 = por %p1328_p8, %p1327_p7 }
  0x21   : > { %p1325_p6 = pneg %p1324_p3 }
  0x23   : > { %p1330_p10 = pnand %p1329_p9, %p1325_p6 }
  0x25   : > { %1333 = shalt.err (!%p1330_p10)
}
  0x26   : > { %1205 = dma.hbm_to_vmem [thread:$0]  (!%p1507_p13), %s270_s17, 256, %s272_s21, %s259_s23, %s1390_s18, %s1390_s18, %s1391_s19  }
  0x27   : > { %283 = sbr.rel (%p1475_p5) target bundleno = 518 (0x206), region = 48  ;;  %s285_s10 = sand.u32 (!%p1475_p5), 1, %s1379_s27  }
  0x28   : > { %s924_s20 = sshll.u32 (!%p1475_p5), %s285_s10, 4  ;;  %s286_s11 = scalar_lea.sflag (!%p1475_p5), [#allocation4], %s285_s10 }
  0x29   : > { %s1527_s14 = scalar_lea.vmem (!%p1475_p5), [#allocation3], %s924_s20 }
  0x2c   : > { %1366 = dma.done.wait (%p1468_p4), %s286_s11, 256  }
  0x2d   : > { %1368 = vsyncadd (%p1468_p4), %s286_s11, 4294967040 }
  0x2e   : > { %1370 = dma.done.wait (%p1460_p1), [#allocation6], 6144  }
  0x2f   : > { %1372 = vsyncadd (%p1460_p1), [#allocation6], 4294961152  ;;  %v995_v0 = vld [vmem:[#allocation5 + $0x70] sm:$0xf]  ;;  %v1152_v1 = vld [vmem:[#allocation5 + $0x74] sm:$0xf0] }
  0x30   : > { %v1059_v2 = vld [vmem:[#allocation5 + $0xf0] sm:$0xf]  ;;  %v996_v3 = vor.u32 %v1152_v1, %v995_v0  ;;  %v1168_v4 = vld [vmem:[#allocation5 + $0xf4] sm:$0xf0]  ;;  %v1151_v5 = vld [vmem:[#allocation5 + $0x74] sm:$0xf] }
  0x31   : > { %v997_v6 = vld [vmem:[#allocation5 + $0x78] sm:$0xf0]  ;;  %v1060_v7 = vor.u32 %v1168_v4, %v1059_v2  ;;  %v1167_v9 = vld [vmem:[#allocation5 + $0xf4] sm:$0xf]  ;;  %v987_v11 = vld [vmem:[#allocation5 + $0x60] sm:$0xf] }
  0x32   : > { %v1000_v8 = vor.u32 %v1151_v5, %v997_v6  ;;  %v1061_v10 = vld [vmem:[#allocation5 + $0xf8] sm:$0xf0]  ;;  %548 = vmatpush.bf16.msra.mxu0 %v996_v3  ;;  %v1150_v13 = vld [vmem:[#allocation5 + $0x64] sm:$0xf0]  ;;  %v1051_v14 = vld [vmem:[#allocation5 + $0xe0] sm:$0xf] }
  0x33   : > { %v1064_v12 = vor.u32 %v1167_v9, %v1061_v10  ;;  %v1166_v15 = vld [vmem:[#allocation5 + $0xe4] sm:$0xf0]  ;;  %562 = vmatpush.bf16.msra.mxu1 %v1060_v7  ;;  %v988_v16 = vor.u32 %v1150_v13, %v987_v11  ;;  %v1149_v18 = vld [vmem:[#allocation5 + $0x64] sm:$0xf]  ;;  %v989_v19 = vld [vmem:[#allocation5 + $0x68] sm:$0xf0] }
  0x34   : > { %576 = vmatpush.bf16.msra.mxu2 %v1000_v8  ;;  %v1052_v17 = vor.u32 %v1166_v15, %v1051_v14  ;;  %v1165_v20 = vld [vmem:[#allocation5 + $0xe4] sm:$0xf]  ;;  %v992_v21 = vor.u32 %v1149_v18, %v989_v19  ;;  %v1053_v22 = vld [vmem:[#allocation5 + $0xe8] sm:$0xf0]  ;;  %v979_v23 = vld [vmem:[#allocation5 + $0x50] sm:$0xf] }
  0x35   : > { %590 = vmatpush.bf16.msra.mxu3 %v1064_v12  ;;  %v1148_v24 = vld [vmem:[#allocation5 + $0x54] sm:$0xf0]  ;;  %v1056_v25 = vor.u32 %v1165_v20, %v1053_v22  ;;  %v1043_v26 = vld [vmem:[#allocation5 + $0xd0] sm:$0xf]  ;;  %v1147_v28 = vld [vmem:[#allocation5 + $0x54] sm:$0xf] }
  0x36   : > { %v1164_v27 = vld [vmem:[#allocation5 + $0xd4] sm:$0xf0]  ;;  %549 = vmatpush.bf16.msra.mxu0 %v988_v16  ;;  %v980_v29 = vor.u32 %v1148_v24, %v979_v23  ;;  %v981_v30 = vld [vmem:[#allocation5 + $0x58] sm:$0xf0]  ;;  %v1163_v31 = vld [vmem:[#allocation5 + $0xd4] sm:$0xf] }
  0x37   : > { %v1045_v32 = vld [vmem:[#allocation5 + $0xd8] sm:$0xf0]  ;;  %563 = vmatpush.bf16.msra.mxu1 %v1052_v17  ;;  %v1044_v33 = vor.u32 %v1164_v27, %v1043_v26  ;;  %v984_v34 = vor.u32 %v1147_v28, %v981_v30  ;;  %v971_v35 = vld [vmem:[#allocation5 + $0x40] sm:$0xf]  ;;  %v1146_v36 = vld [vmem:[#allocation5 + $0x44] sm:$0xf0] }
  0x38   : > { %577 = vmatpush.bf16.msra.mxu2 %v992_v21  ;;  %v1035_v37 = vld [vmem:[#allocation5 + $0xc0] sm:$0xf]  ;;  %v1048_v38 = vor.u32 %v1163_v31, %v1045_v32  ;;  %v1162_v39 = vld [vmem:[#allocation5 + $0xc4] sm:$0xf0]  ;;  %v1145_v40 = vld [vmem:[#allocation5 + $0x44] sm:$0xf]  ;;  %v972_v44 = vor.u32 %v1146_v36, %v971_v35 }
  0x39   : > { %591 = vmatpush.bf16.msra.mxu3 %v1056_v25  ;;  %v973_v41 = vld [vmem:[#allocation5 + $0x48] sm:$0xf0]  ;;  %v1161_v42 = vld [vmem:[#allocation5 + $0xc4] sm:$0xf]  ;;  %v1036_v45 = vor.u32 %v1162_v39, %v1035_v37  ;;  %v963_v47 = vld [vmem:[#allocation5 + $0x30] sm:$0xf] }
  0x3a   : > { %v1037_v43 = vld [vmem:[#allocation5 + $0xc8] sm:$0xf0]  ;;  %550 = vmatpush.bf16.msra.mxu0 %v980_v29  ;;  %v976_v46 = vor.u32 %v1145_v40, %v973_v41  ;;  %v1144_v48 = vld [vmem:[#allocation5 + $0x34] sm:$0xf0]  ;;  %v1027_v49 = vld [vmem:[#allocation5 + $0xb0] sm:$0xf] }
  0x3b   : > { %564 = vmatpush.bf16.msra.mxu1 %v1044_v33  ;;  %v1040_v50 = vor.u32 %v1161_v42, %v1037_v43  ;;  %v1160_v51 = vld [vmem:[#allocation5 + $0xb4] sm:$0xf0]  ;;  %v1143_v52 = vld [vmem:[#allocation5 + $0x34] sm:$0xf]  ;;  %v965_v53 = vld [vmem:[#allocation5 + $0x38] sm:$0xf0]  ;;  %v964_v56 = vor.u32 %v1144_v48, %v963_v47 }
  0x3c   : > { %578 = vmatpush.bf16.msra.mxu2 %v984_v34  ;;  %v1159_v54 = vld [vmem:[#allocation5 + $0xb4] sm:$0xf]  ;;  %v1029_v55 = vld [vmem:[#allocation5 + $0xb8] sm:$0xf0]  ;;  %v1028_v57 = vor.u32 %v1160_v51, %v1027_v49  ;;  %v968_v58 = vor.u32 %v1143_v52, %v965_v53  ;;  %v955_v59 = vld [vmem:[#allocation5 + $0x20] sm:$0xf] }
  0x3d   : > { %592 = vmatpush.bf16.msra.mxu3 %v1048_v38  ;;  %v1142_v60 = vld [vmem:[#allocation5 + $0x24] sm:$0xf0]  ;;  %v1019_v61 = vld [vmem:[#allocation5 + $0xa0] sm:$0xf]  ;;  %v1032_v62 = vor.u32 %v1159_v54, %v1029_v55  ;;  %v1141_v0 = vld [vmem:[#allocation5 + $0x24] sm:$0xf] }
  0x3e   : > { %551 = vmatpush.bf16.msra.mxu0 %v972_v44  ;;  %v1158_v63 = vld [vmem:[#allocation5 + $0xa4] sm:$0xf0]  ;;  %v957_v1 = vld [vmem:[#allocation5 + $0x28] sm:$0xf0]  ;;  %v1157_v2 = vld [vmem:[#allocation5 + $0xa4] sm:$0xf]  ;;  %v956_v4 = vor.u32 %v1142_v60, %v955_v59 }
  0x3f   : > { %565 = vmatpush.bf16.msra.mxu1 %v1036_v45  ;;  %v1021_v3 = vld [vmem:[#allocation5 + $0xa8] sm:$0xf0]  ;;  %v1020_v5 = vor.u32 %v1158_v63, %v1019_v61  ;;  %v960_v6 = vor.u32 %v1141_v0, %v957_v1  ;;  %v947_v7 = vld [vmem:[#allocation5 + $0x10] sm:$0xf]  ;;  %v1140_v8 = vld [vmem:[#allocation5 + $0x14] sm:$0xf0] }
  0x40   : > { %579 = vmatpush.bf16.msra.mxu2 %v976_v46  ;;  %v1011_v9 = vld [vmem:[#allocation5 + $0x90] sm:$0xf]  ;;  %v1024_v10 = vor.u32 %v1157_v2, %v1021_v3  ;;  %v1156_v11 = vld [vmem:[#allocation5 + $0x94] sm:$0xf0]  ;;  %v1139_v12 = vld [vmem:[#allocation5 + $0x14] sm:$0xf]  ;;  %v948_v16 = vor.u32 %v1140_v8, %v947_v7 }
  0x41   : > { %593 = vmatpush.bf16.msra.mxu3 %v1040_v50  ;;  %v949_v13 = vld [vmem:[#allocation5 + $0x18] sm:$0xf0]  ;;  %v1155_v14 = vld [vmem:[#allocation5 + $0x94] sm:$0xf]  ;;  %v939_v17 = vld [vmem:[#allocation5] sm:$0xf]  ;;  %v1012_v19 = vor.u32 %v1156_v11, %v1011_v9 }
  0x42   : > { %552 = vmatpush.bf16.msra.mxu0 %v964_v56  ;;  %v1013_v15 = vld [vmem:[#allocation5 + $0x98] sm:$0xf0]  ;;  %v1138_v18 = vld [vmem:[#allocation5 + $0x4] sm:$0xf0]  ;;  %v952_v20 = vor.u32 %v1139_v12, %v949_v13  ;;  %v1003_v21 = vld [vmem:[#allocation5 + $0x80] sm:$0xf] }
  0x43   : > { %566 = vmatpush.bf16.msra.mxu1 %v1028_v57  ;;  %v1154_v22 = vld [vmem:[#allocation5 + $0x84] sm:$0xf0]  ;;  %v1137_v23 = vld [vmem:[#allocation5 + $0x4] sm:$0xf]  ;;  %v1016_v24 = vor.u32 %v1155_v14, %v1013_v15  ;;  %v941_v25 = vld [vmem:[#allocation5 + $0x8] sm:$0xf0]  ;;  %v940_v28 = vor.u32 %v1138_v18, %v939_v17 }
  0x44   : > { %580 = vmatpush.bf16.msra.mxu2 %v968_v58  ;;  %v1153_v26 = vld [vmem:[#allocation5 + $0x84] sm:$0xf]  ;;  %v1005_v27 = vld [vmem:[#allocation5 + $0x88] sm:$0xf0]  ;;  %v931_v29 = vld [vmem:[%s1527_s14] sm:$0xf]  ;;  %v1004_v31 = vor.u32 %v1154_v22, %v1003_v21  ;;  %v944_v32 = vor.u32 %v1137_v23, %v941_v25 }
  0x45   : > { %594 = vmatpush.bf16.msra.mxu3 %v1032_v62  ;;  %v1136_v30 = vld [vmem:[%s1527_s14 + $0x4] sm:$0xf0]  ;;  %v1135_v33 = vld [vmem:[%s1527_s14 + $0x4] sm:$0xf]  ;;  %v933_v34 = vld [vmem:[%s1527_s14 + $0x8] sm:$0xf0]  ;;  %v1008_v35 = vor.u32 %v1153_v26, %v1005_v27 }
  0x46   : > { %553 = vmatpush.bf16.msra.mxu0 %v956_v4  ;;  %v1176_v36 = vld [vmem:[#allocation7 + $0x38] sm:$0xff]  ;;  %v932_v37 = vor.u32 %v1136_v30, %v931_v29  ;;  %v936_v39 = vor.u32 %v1135_v33, %v933_v34  ;;  %v1175_v40 = vld [vmem:[#allocation7 + $0x30] sm:$0xff]  ;;  %v1174_v42 = vld [vmem:[#allocation7 + $0x28] sm:$0xff]  ;;  %s782_s21 = sld [smem:[#allocation2]]  ;;  %s927_s22 = sshll.u32 %s913_s6, 1  ;;  %vm824_vm2 = vcmask 7168  }
  0x47   : > { %567 = vmatpush.bf16.msra.mxu1 %v1020_v5  ;;  %v1184_v38 = vld [vmem:[#allocation7 + $0x78] sm:$0xff]  ;;  %v1183_v41 = vld [vmem:[#allocation7 + $0x70] sm:$0xff]  ;;  %v1173_v43 = vld [vmem:[#allocation7 + $0x20] sm:$0xff]  ;;  %p333_p1 = scmp.lt.s32.totalorder %s927_s22, 5 }
  0x48   : > { %581 = vmatpush.bf16.msra.mxu2 %v960_v6  ;;  %v1182_v44 = vld [vmem:[#allocation7 + $0x68] sm:$0xff]  ;;  %v1172_v45 = vld [vmem:[#allocation7 + $0x18] sm:$0xff]  ;;  %v1181_v46 = vld [vmem:[#allocation7 + $0x60] sm:$0xff] }
  0x49   : > { %595 = vmatpush.bf16.msra.mxu3 %v1024_v10  ;;  %v1171_v47 = vld [vmem:[#allocation7 + $0x10] sm:$0xff]  ;;  %v1180_v48 = vld [vmem:[#allocation7 + $0x58] sm:$0xff]  ;;  %v1170_v49 = vld [vmem:[#allocation7 + $0x8] sm:$0xff]  ;;  %s1587_s22 = smov (!%p333_p1, %s927_s22), 5 }
  0x4a   : > { %554 = vmatpush.bf16.msra.mxu0 %v948_v16  ;;  %v1179_v50 = vld [vmem:[#allocation7 + $0x50] sm:$0xff]  ;;  %v1169_v51 = vld [vmem:[#allocation7] sm:$0xff]  ;;  %v1178_v52 = vld [vmem:[#allocation7 + $0x48] sm:$0xff]  ;;  %s928_s23 = sshll.u32 %s1587_s22, 3 }
  0x4b   : > { %568 = vmatpush.bf16.msra.mxu1 %v1012_v19  ;;  %v1177_v53 = vld [vmem:[#allocation7 + $0x40] sm:$0xff]  ;;  %s336_s6 = scalar_lea.vmem %s1577_s7, %s928_s23 }
  0x4c   : > { %582 = vmatpush.bf16.msra.mxu2 %v952_v20  ;;  %v372_v54 = vld [vmem:[%s1572_s2] sm:$0x3]  ;;  %v783_v29 = vstv %s782_s21 }
  0x4d   : > { %596 = vmatpush.bf16.msra.mxu3 %v1016_v24  ;;  %v374_v56 = vperm.slane %v372_v54, 0  ;;  %v375_v60 = vperm.slane %v372_v54, 1  ;;  %v1249_v16 = vld [vmem:[%s1574_s4] ss:$0 sm:$0xff] }
  0x4e   : > { %555 = vmatpush.bf16.msra.mxu0 %v940_v28  ;;  %v1250_v20 = vld [vmem:[%s1575_s5] ss:$0 sm:$0xff] }
  0x4f   : > { %569 = vmatpush.bf16.msra.mxu1 %v1004_v31 }
  0x50   : > { %583 = vmatpush.bf16.msra.mxu2 %v944_v32 }
  0x51   : > { %597 = vmatpush.bf16.msra.mxu3 %v1008_v35  ;;  %556 = vmatmul.bf16.vlgmr.msra.gmra.mxu0 %v932_v37 }
  0x52   : > { %742 = vmatpush.bf16.msrb.mxu0 %v1176_v36  ;;  %570 = vmatmul.bf16.vlgmr.msra.gmra.mxu1 %v936_v39 }
  0x53   : > { %756 = vmatpush.bf16.msrb.mxu1 %v1184_v38  ;;  %584 = vmatmul.bf16.vlgmr.msra.gmra.mxu2 %v932_v37 }
  0x54   : > { %598 = vmatmul.bf16.vlgmr.msra.gmra.mxu3 %v936_v39 }
  0x56   : > { %743 = vmatpush.bf16.msrb.mxu0 %v1175_v40 }
  0x57   : > { %757 = vmatpush.bf16.msrb.mxu1 %v1183_v41 }
  0x5a   : > { %744 = vmatpush.bf16.msrb.mxu0 %v1174_v42 }
  0x5b   : > { %758 = vmatpush.bf16.msrb.mxu1 %v1182_v44 }
  0x5e   : > { %745 = vmatpush.bf16.msrb.mxu0 %v1173_v43 }
  0x5f   : > { %759 = vmatpush.bf16.msrb.mxu1 %v1181_v46 }
  0x62   : > { %746 = vmatpush.bf16.msrb.mxu0 %v1172_v45 }
  0x63   : > { %760 = vmatpush.bf16.msrb.mxu1 %v1180_v48 }
  0x66   : > { %747 = vmatpush.bf16.msrb.mxu0 %v1171_v47 }
  0x67   : > { %761 = vmatpush.bf16.msrb.mxu1 %v1179_v50 }
  0x6a   : > { %748 = vmatpush.bf16.msrb.mxu0 %v1170_v49 }
  0x6b   : > { %762 = vmatpush.bf16.msrb.mxu1 %v1178_v52 }
  0x6e   : > { %749 = vmatpush.bf16.msrb.mxu0 %v1169_v51 }
  0x6f   : > { %763 = vmatpush.bf16.msrb.mxu1 %v1177_v53 }
  0xce   : > { %v557_v55 = vpop.f32.mrf.mxu0 }
  0xcf   : > { %v571_v57 = vpop.f32.mrf.mxu1  ;;  %v558_v58 = vadd.f32 %v557_v55, %v374_v56 }
  0xd1   : > { %v572_v63 = vadd.f32 %v571_v57, %v558_v58 }
  0xd3   : > { %v604_v4 = vmax.f32 %v572_v63, 0.0 }
  0xd6   : > { %v585_v59 = vpop.f32.mrf.mxu2  ;;  %v559_v62 = vpop.f32.mrf.mxu0 }
  0xd7   : > { %v599_v61 = vpop.f32.mrf.mxu3  ;;  %v560_v0 = vadd.f32 %v559_v62, %v374_v56  ;;  %v573_v1 = vpop.f32.mrf.mxu1  ;;  %v586_v3 = vadd.f32 %v585_v59, %v375_v60 }
  0xd9   : > { %v574_v2 = vadd.f32 %v573_v1, %v560_v0  ;;  %v600_v8 = vadd.f32 %v599_v61, %v586_v3 }
  0xdb   : > { %v606_v5 = vmax.f32 %v574_v2, 0.0  ;;  %v605_v12 = vmax.f32 %v600_v8, 0.0 }
  0xdd   : > { %v608_v6 = vpack.c.bf16 %v606_v5, %v604_v4 }
  0xde   : > { %v587_v7 = vpop.f32.mrf.mxu2 }
  0xdf   : > { %v588_v9 = vadd.f32 %v587_v7, %v375_v60  ;;  %v601_v10 = vpop.f32.mrf.mxu3  ;;  %750 = vmatmul.bf16.vlgmr.msrb.gmra.mxu0 %v608_v6 }
  0xe1   : > { %v602_v11 = vadd.f32 %v601_v10, %v588_v9 }
  0xe3   : > { %v607_v13 = vmax.f32 %v602_v11, 0.0 }
  0xe5   : > { %v609_v14 = vpack.c.bf16 %v607_v13, %v605_v12 }
  0xe7   : > { %764 = vmatmul.bf16.vlgmr.msrb.gmra.mxu1 %v609_v14 }
 0x15c   : > { %v751_v15 = vpop.f32.mrf.mxu0 }
 0x15d   : > { %v752_v17 = vadd.f32 %v1249_v16, %v751_v15 }
 0x164   : > { %v765_v18 = vpop.f32.mrf.mxu1  ;;  %v753_v22 = vpop.f32.mrf.mxu0 }
 0x165   : > { %v766_v19 = vadd.f32 %v765_v18, %v752_v17  ;;  %v754_v24 = vadd.f32 %v1249_v16, %v753_v22 }
 0x167   : > { %v770_v21 = vmax.f32 %v766_v19, 0.0 }
 0x169   : > { %v776_v23 = vmul.f32 %v1250_v20, %v770_v21 }
 0x16b   : > { %778 = vadd.xlane.f32.xlu0 %v776_v23 }
 0x16c   : > { %v767_v25 = vpop.f32.mrf.mxu1 }
 0x16d   : > { %v768_v26 = vadd.f32 %v767_v25, %v754_v24 }
 0x16f   : > { %v771_v27 = vmax.f32 %v768_v26, 0.0 }
 0x171   : > { %v777_v28 = vmul.f32 %v1250_v20, %v771_v27 }
 0x173   : > { %780 = vadd.xlane.f32.xlu0 %v777_v28 }
 0x1de   : > { %v779_v30 = vpop.xlane.xlu0 %778 }
 0x1df   : > { %v784_v31 = vadd.f32 %v783_v29, %v779_v30 }
 0x1e1   : > { %v1129_v32 = vmul.f32 -1.442695, %v784_v31 }
 0x1e3   : > { %1251 = vpow2.f32 %v1129_v32 }
 0x1e6   : > { %v781_v33 = vpop.xlane.xlu0 %780 }
 0x1e7   : > { %v785_v34 = vadd.f32 %v783_v29, %v781_v33 }
 0x1e9   : > { %v1252_v35 = vpop.eup %1251  ;;  %v1130_v36 = vmul.f32 -1.442695, %v785_v34 }
 0x1ea   : > { %v792_v37 = vadd.f32 1.0, %v1252_v35 }
 0x1eb   : > { %1253 = vpow2.f32 %v1130_v36 }
 0x1ec   : > { %1255 = vrcp.f32 %v792_v37  ;;  %v805_v43 = vand.u32 2147483648, %v792_v37  ;;  %v803_v45 = vand.u32 2147483647, %v792_v37  ;;  %vm799_vm1 = vweird.f32 %v792_v37 }
 0x1ee   : > { %v806_v48 = vor.u32 1.1754944e-38, %v805_v43  ;;  %vm804_vm4 = vcmp.eq.f32.partialorder %v803_v45, 8.507059e+37 }
 0x1f1   : > { %v1254_v38 = vpop.eup %1253 }
 0x1f2   : > { %v1256_v39 = vpop.eup %1255  ;;  %v793_v40 = vadd.f32 1.0, %v1254_v38 }
 0x1f3   : > { %v795_v41 = vmul.f32 %v1256_v39, %v792_v37  ;;  %vm800_vm0 = vweird.f32 %v1256_v39 }
 0x1f4   : > { %1257 = vrcp.f32 %v793_v40  ;;  %vm801_vm3 = vmor %vm799_vm1, %vm800_vm0  ;;  %v820_v53 = vand.u32 2147483648, %v793_v40  ;;  %v818_v55 = vand.u32 2147483647, %v793_v40  ;;  %vm814_vm6 = vweird.f32 %v793_v40 }
 0x1f5   : > { %v796_v42 = vsub.f32 1.0, %v795_v41 }
 0x1f6   : > { %v821_v57 = vor.u32 1.1754944e-38, %v820_v53  ;;  %vm819_vm8 = vcmp.eq.f32.partialorder %v818_v55, 8.507059e+37 }
 0x1f7   : > { %v797_v44 = vmul.f32 %v1256_v39, %v796_v42 }
 0x1f9   : > { %v798_v46 = vadd.f32 %v1256_v39, %v797_v44 }
 0x1fa   : > { %v1258_v47 = vpop.eup %1257 }
 0x1fb   : > { %v802_v49 = vsel %vm801_vm3, %v1256_v39, %v798_v46  ;;  %v810_v50 = vmul.f32 %v1258_v47, %v793_v40  ;;  %vm815_vm5 = vweird.f32 %v1258_v47 }
 0x1fc   : > { %v807_v51 = vsel %vm804_vm4, %v806_v48, %v802_v49  ;;  %vm816_vm7 = vmor %vm814_vm6, %vm815_vm5 }
 0x1fd   : > { %825 = vst.msk [vmem:[%s336_s6] sm:$0xff] %vm824_vm2, %v807_v51  ;;  %v811_v52 = vsub.f32 1.0, %v810_v50 }
 0x1ff   : > { %v812_v54 = vmul.f32 %v1258_v47, %v811_v52 }
 0x201   : > { %v813_v56 = vadd.f32 %v1258_v47, %v812_v54 }
 0x203   : > { %v817_v58 = vsel %vm816_vm7, %v1258_v47, %v813_v56 }
 0x204   : > { %v822_v59 = vsel %vm819_vm8, %v821_v57, %v817_v58 }
 0x205   : > { %826 = vst.msk [vmem:[%s336_s6 + $0x8] sm:$0xff] %vm824_vm2, %v822_v59 }
 0x206 PF: > { %p19_p4 = scmp.ge.s32.totalorder %s1490_s24, 5   ;;  %s1582_s26 = smov %s1379_s27 }
 0x207   : > { %s1583_s27 = smov %s1383_s28  ;;  %s1584_s28 = smov %s1499_s9 }
 0x208   : > { %s1585_s29 = smov %s1490_s24  ;;  %21 = sbr.rel (!%p19_p4) target bundleno = 6 (0x6), region = 96 }
 0x20d   :  { %849 = vsyncpa [#allocation4], 1 }
 0x20e   :  { %851 = vsyncpa [#allocation4 + $0x1], 1 }
 0x20f   :  { %852 = vsyncpa [#allocation6], 1 }

// kernel: tpu_custom_call.1
= control target key start
LH: loop header
LB: loop body
LE: loop exit
PB: predicated region body
PF: predicated region fallthrough
CT: control target
= control target key end

     0   :  { %s1570_s0 = inlined_call_operand.hbm [shape: bf16[48,256], index: 0, kind: input, shape index: {}]   ;;  %s1571_s1 = inlined_call_operand.hbm [shape: bf16[256,256], index: 1, kind: input, shape index: {}]   ;;  %s1572_s2 = inlined_call_operand.vmem [shape: f32[1,256], index: 2, kind: input, shape index: {}]   ;;  %s1573_s3 = inlined_call_operand.hbm [shape: bf16[256,128], index: 3, kind: input, shape index: {}]   ;;  %s1574_s4 = inlined_call_operand.vmem [shape: f32[1,128], index: 4, kind: input, shape index: {}]   ;;  %s1575_s5 = inlined_call_operand.vmem [shape: f32[1,128], index: 5, kind: input, shape index: {}]   ;;  %s1576_s6 = inlined_call_operand.<no memory space> [shape: f32[1], index: 6, kind: input, shape index: {}]   ;;  %s1577_s7 = inlined_call_operand.vmem [shape: f32[48,1], index: 7, kind: output, shape index: {}]  }
   0x1   :  { %12 = sst [smem:[#allocation2]] %s1576_s6 }
   0x2   :  { %13 = vsyncpa [#allocation4], 0 }
   0x3   :  { %15 = vsyncpa [#allocation4 + $0x1], 0 }
   0x4   :  { %16 = vsyncpa [#allocation6], 0  ;;  %s1438_s26 = smov 0   ;;  %s1440_s27 = smov 0  }
   0x5   :  { %s1442_s28 = smov 0   ;;  %s1444_s29 = smov 0  }
   0x6 LB: > { %s913_s6 = sadd.s32 4294967295, %s1387_s29   ;;  %p42_p0 = scmp.ne.s32.totalorder %s1379_s27, %s1375_s26  ;;  %s1387_s29 = sphi %s1444_s29, %s1585_s29   ;;  %s1383_s28 = sphi %s1442_s28, %s1584_s28   ;;  %s1379_s27 = sphi %s1440_s27, %s1583_s27   ;;  %s1375_s26 = sphi %s1438_s26, %s1582_s26  }
   0x7   : > { %p1460_p1 = scmp.eq.s32.totalorder %s913_s6, 0  ;;  %p915_p2 = scmp.ge.s32.totalorder %s1387_s29, 1 }
   0x8   : > { %p205_p3 = scmp.lt.s32.totalorder %s1387_s29, 4  ;;  %s216_s11 = sshll.u32 %s1571_s1, 4  ;;  %s217_s11 = int_to_ptr.hbm [resolvable:$true] %s216_s11 }
   0x9   : > { %p1468_p4 = por %p1460_p1, %p42_p0  ;;  %s1389_s13 = smov [#allocation5]  }
   0xa   : > { %p1475_p5 = pnand %p915_p2, %p205_p3  ;;  %s218_s14 = sshll.u32 %s1389_s13, 4  ;;  %s219_s14 = int_to_ptr.vmem [resolvable:$true] %s218_s14 }
   0xb   : > { %s233_s17 = sshll.u32 %s1573_s3, 4  ;;  %s1390_s18 = smov 128   ;;  %s234_s17 = int_to_ptr.hbm [resolvable:$true] %s233_s17 }
   0xc   : > { %p1195_p6 = pneg %p1475_p5  ;;  %s1391_s19 = smov 8  }
   0xd   : > { %s1392_s20 = smov [#allocation7]   ;;  %s1393_s22 = smov 64  }
   0xe   : > { %p1196_p7 = pnand %p1195_p6, %p1460_p1  ;;  %s235_s21 = sshll.u32 %s1392_s20, 4  ;;  %s236_s21 = int_to_ptr.vmem [resolvable:$true] %s235_s21 }
   0xf   : > { %s1394_s23 = smov 4   ;;  %s1490_s24 = sadd.s32 1, %s1387_s29  }
  0x10   : > { %1198 = dma.hbm_to_vmem [thread:$0]  (!%p1196_p7), %s217_s11, 4096, %s219_s14, [#allocation6], %s1390_s18, %s1390_s18, %s1391_s19  }
  0x11   : > { %1201 = dma.hbm_to_vmem [thread:$0]  (!%p1196_p7), %s234_s17, 2048, %s236_s21, [#allocation6], %s1393_s22, %s1393_s22, %s1394_s23  }
  0x12   : > { %s26_s25 = ssub.s32 %s1387_s29, %s1490_s24  ;;  %s29_s26 = sadd.s32 1, %s1383_s28 }
  0x13   : > { %p27_p8 = scmp.eq.s32.totalorder %s26_s25, 0  ;;  %p36_p9 = scmp.ne.s32.totalorder %s1383_s28, %s1379_s27 }
  0x14   : > { %p37_p10 = scmp.eq.s32.totalorder %s1387_s29, 0  ;;  %s258_s10 = sand.u32 1, %s1383_s28  }
  0x15   : > { %s1499_s9 = scalar_select %p27_p8, %s1383_s28, %s29_s26  }
  0x16   : > { %p38_p11 = por %p37_p10, %p36_p9  ;;  %s1134_s11 = sshll.u32 %s1387_s29, 4 }
  0x17   : > { %p1208_p12 = scmp.lt.s32.totalorder %s1387_s29, 3  ;;  %s919_s13 = sshll.u32 %s258_s10, 4 }
  0x18   : > { %s268_s16 = scalar_lea.hbm %s1570_s0, %s1134_s11  ;;  %s262_s20 = scalar_lea.vmem [#allocation3], %s919_s13 }
  0x19   : > { %s269_s17 = sshll.u32 %s268_s16, 4  ;;  %s271_s21 = sshll.u32 %s262_s20, 4  ;;  %s270_s17 = int_to_ptr.hbm [resolvable:$true] %s269_s17  ;;  %s272_s21 = int_to_ptr.vmem [resolvable:$true] %s271_s21 }
  0x1a   : > { %p1507_p13 = pnand %p1208_p12, %p38_p11  ;;  %s259_s23 = scalar_lea.sflag [#allocation4], %s258_s10 }
  0x1b   : > { %s1319_s25 = sshra.s32 %s270_s17, 4  ;;  %s1326_s13 = scalar_lea.hbm %s1570_s0, 48  ;;  %s1320_s25 = int_to_ptr.hbm [resolvable:$true] %s1319_s25 }
  0x1c   : > { %s1321_s26 = scalar_lea.hbm %s1320_s25, 16  ;;  %p1323_p2 = pneg %p1507_p13 }
  0x1d   : > { %p1322_p0 = scmp.ne.s32.totalorder %s1320_s25, %s1321_s26  ;;  %p1327_p7 = scmp.lt.s32.totalorder %s1320_s25, %s1570_s0 }
  0x1e   : > { %p1328_p8 = scmp.lt.s32.totalorder %s1326_s13, %s1321_s26 }
  0x1f   : > { %p1324_p3 = pnand %p1323_p2, %p1322_p0 }
  0x20   : > { %p1329_p9 = por %p1328_p8, %p1327_p7 }
  0x21   : > { %p1325_p6 = pneg %p1324_p3 }
  0x23   : > { %p1330_p10 = pnand %p1329_p9, %p1325_p6 }
  0x25   : > { %1333 = shalt.err (!%p1330_p10)
}
  0x26   : > { %1205 = dma.hbm_to_vmem [thread:$0]  (!%p1507_p13), %s270_s17, 256, %s272_s21, %s259_s23, %s1390_s18, %s1390_s18, %s1391_s19  }
  0x27   : > { %283 = sbr.rel (%p1475_p5) target bundleno = 518 (0x206), region = 48  ;;  %s285_s10 = sand.u32 (!%p1475_p5), 1, %s1379_s27  }
  0x28   : > { %s924_s20 = sshll.u32 (!%p1475_p5), %s285_s10, 4  ;;  %s286_s11 = scalar_lea.sflag (!%p1475_p5), [#allocation4], %s285_s10 }
  0x29   : > { %s1527_s14 = scalar_lea.vmem (!%p1475_p5), [#allocation3], %s924_s20 }
  0x2c   : > { %1366 = dma.done.wait (%p1468_p4), %s286_s11, 256  }
  0x2d   : > { %1368 = vsyncadd (%p1468_p4), %s286_s11, 4294967040 }
  0x2e   : > { %1370 = dma.done.wait (%p1460_p1), [#allocation6], 6144  }
  0x2f   : > { %1372 = vsyncadd (%p1460_p1), [#allocation6], 4294961152  ;;  %v995_v0 = vld [vmem:[#allocation5 + $0x70] sm:$0xf]  ;;  %v1152_v1 = vld [vmem:[#allocation5 + $0x74] sm:$0xf0] }
  0x30   : > { %v1059_v2 = vld [vmem:[#allocation5 + $0xf0] sm:$0xf]  ;;  %v996_v3 = vor.u32 %v1152_v1, %v995_v0  ;;  %v1168_v4 = vld [vmem:[#allocation5 + $0xf4] sm:$0xf0]  ;;  %v1151_v5 = vld [vmem:[#allocation5 + $0x74] sm:$0xf] }
  0x31   : > { %v997_v6 = vld [vmem:[#allocation5 + $0x78] sm:$0xf0]  ;;  %v1060_v7 = vor.u32 %v1168_v4, %v1059_v2  ;;  %v1167_v9 = vld [vmem:[#allocation5 + $0xf4] sm:$0xf]  ;;  %v987_v11 = vld [vmem:[#allocation5 + $0x60] sm:$0xf] }
  0x32   : > { %v1000_v8 = vor.u32 %v1151_v5, %v997_v6  ;;  %v1061_v10 = vld [vmem:[#allocation5 + $0xf8] sm:$0xf0]  ;;  %548 = vmatpush.bf16.msra.mxu0 %v996_v3  ;;  %v1150_v13 = vld [vmem:[#allocation5 + $0x64] sm:$0xf0]  ;;  %v1051_v14 = vld [vmem:[#allocation5 + $0xe0] sm:$0xf] }
  0x33   : > { %v1064_v12 = vor.u32 %v1167_v9, %v1061_v10  ;;  %v1166_v15 = vld [vmem:[#allocation5 + $0xe4] sm:$0xf0]  ;;  %562 = vmatpush.bf16.msra.mxu1 %v1060_v7  ;;  %v988_v16 = vor.u32 %v1150_v13, %v987_v11  ;;  %v1149_v18 = vld [vmem:[#allocation5 + $0x64] sm:$0xf]  ;;  %v989_v19 = vld [vmem:[#allocation5 + $0x68] sm:$0xf0] }
  0x34   : > { %576 = vmatpush.bf16.msra.mxu2 %v1000_v8  ;;  %v1052_v17 = vor.u32 %v1166_v15, %v1051_v14  ;;  %v1165_v20 = vld [vmem:[#allocation5 + $0xe4] sm:$0xf]  ;;  %v992_v21 = vor.u32 %v1149_v18, %v989_v19  ;;  %v1053_v22 = vld [vmem:[#allocation5 + $0xe8] sm:$0xf0]  ;;  %v979_v23 = vld [vmem:[#allocation5 + $0x50] sm:$0xf] }
  0x35   : > { %590 = vmatpush.bf16.msra.mxu3 %v1064_v12  ;;  %v1148_v24 = vld [vmem:[#allocation5 + $0x54] sm:$0xf0]  ;;  %v1056_v25 = vor.u32 %v1165_v20, %v1053_v22  ;;  %v1043_v26 = vld [vmem:[#allocation5 + $0xd0] sm:$0xf]  ;;  %v1147_v28 = vld [vmem:[#allocation5 + $0x54] sm:$0xf] }
  0x36   : > { %v1164_v27 = vld [vmem:[#allocation5 + $0xd4] sm:$0xf0]  ;;  %549 = vmatpush.bf16.msra.mxu0 %v988_v16  ;;  %v980_v29 = vor.u32 %v1148_v24, %v979_v23  ;;  %v981_v30 = vld [vmem:[#allocation5 + $0x58] sm:$0xf0]  ;;  %v1163_v31 = vld [vmem:[#allocation5 + $0xd4] sm:$0xf] }
  0x37   : > { %v1045_v32 = vld [vmem:[#allocation5 + $0xd8] sm:$0xf0]  ;;  %563 = vmatpush.bf16.msra.mxu1 %v1052_v17  ;;  %v1044_v33 = vor.u32 %v1164_v27, %v1043_v26  ;;  %v984_v34 = vor.u32 %v1147_v28, %v981_v30  ;;  %v971_v35 = vld [vmem:[#allocation5 + $0x40] sm:$0xf]  ;;  %v1146_v36 = vld [vmem:[#allocation5 + $0x44] sm:$0xf0] }
  0x38   : > { %577 = vmatpush.bf16.msra.mxu2 %v992_v21  ;;  %v1035_v37 = vld [vmem:[#allocation5 + $0xc0] sm:$0xf]  ;;  %v1048_v38 = vor.u32 %v1163_v31, %v1045_v32  ;;  %v1162_v39 = vld [vmem:[#allocation5 + $0xc4] sm:$0xf0]  ;;  %v1145_v40 = vld [vmem:[#allocation5 + $0x44] sm:$0xf]  ;;  %v972_v44 = vor.u32 %v1146_v36, %v971_v35 }
  0x39   : > { %591 = vmatpush.bf16.msra.mxu3 %v1056_v25  ;;  %v973_v41 = vld [vmem:[#allocation5 + $0x48] sm:$0xf0]  ;;  %v1161_v42 = vld [vmem:[#allocation5 + $0xc4] sm:$0xf]  ;;  %v1036_v45 = vor.u32 %v1162_v39, %v1035_v37  ;;  %v963_v47 = vld [vmem:[#allocation5 + $0x30] sm:$0xf] }
  0x3a   : > { %v1037_v43 = vld [vmem:[#allocation5 + $0xc8] sm:$0xf0]  ;;  %550 = vmatpush.bf16.msra.mxu0 %v980_v29  ;;  %v976_v46 = vor.u32 %v1145_v40, %v973_v41  ;;  %v1144_v48 = vld [vmem:[#allocation5 + $0x34] sm:$0xf0]  ;;  %v1027_v49 = vld [vmem:[#allocation5 + $0xb0] sm:$0xf] }
  0x3b   : > { %564 = vmatpush.bf16.msra.mxu1 %v1044_v33  ;;  %v1040_v50 = vor.u32 %v1161_v42, %v1037_v43  ;;  %v1160_v51 = vld [vmem:[#allocation5 + $0xb4] sm:$0xf0]  ;;  %v1143_v52 = vld [vmem:[#allocation5 + $0x34] sm:$0xf]  ;;  %v965_v53 = vld [vmem:[#allocation5 + $0x38] sm:$0xf0]  ;;  %v964_v56 = vor.u32 %v1144_v48, %v963_v47 }
  0x3c   : > { %578 = vmatpush.bf16.msra.mxu2 %v984_v34  ;;  %v1159_v54 = vld [vmem:[#allocation5 + $0xb4] sm:$0xf]  ;;  %v1029_v55 = vld [vmem:[#allocation5 + $0xb8] sm:$0xf0]  ;;  %v1028_v57 = vor.u32 %v1160_v51, %v1027_v49  ;;  %v968_v58 = vor.u32 %v1143_v52, %v965_v53  ;;  %v955_v59 = vld [vmem:[#allocation5 + $0x20] sm:$0xf] }
  0x3d   : > { %592 = vmatpush.bf16.msra.mxu3 %v1048_v38  ;;  %v1142_v60 = vld [vmem:[#allocation5 + $0x24] sm:$0xf0]  ;;  %v1019_v61 = vld [vmem:[#allocation5 + $0xa0] sm:$0xf]  ;;  %v1032_v62 = vor.u32 %v1159_v54, %v1029_v55  ;;  %v1141_v0 = vld [vmem:[#allocation5 + $0x24] sm:$0xf] }
  0x3e   : > { %551 = vmatpush.bf16.msra.mxu0 %v972_v44  ;;  %v1158_v63 = vld [vmem:[#allocation5 + $0xa4] sm:$0xf0]  ;;  %v957_v1 = vld [vmem:[#allocation5 + $0x28] sm:$0xf0]  ;;  %v1157_v2 = vld [vmem:[#allocation5 + $0xa4] sm:$0xf]  ;;  %v956_v4 = vor.u32 %v1142_v60, %v955_v59 }
  0x3f   : > { %565 = vmatpush.bf16.msra.mxu1 %v1036_v45  ;;  %v1021_v3 = vld [vmem:[#allocation5 + $0xa8] sm:$0xf0]  ;;  %v1020_v5 = vor.u32 %v1158_v63, %v1019_v61  ;;  %v960_v6 = vor.u32 %v1141_v0, %v957_v1  ;;  %v947_v7 = vld [vmem:[#allocation5 + $0x10] sm:$0xf]  ;;  %v1140_v8 = vld [vmem:[#allocation5 + $0x14] sm:$0xf0] }
  0x40   : > { %579 = vmatpush.bf16.msra.mxu2 %v976_v46  ;;  %v1011_v9 = vld [vmem:[#allocation5 + $0x90] sm:$0xf]  ;;  %v1024_v10 = vor.u32 %v1157_v2, %v1021_v3  ;;  %v1156_v11 = vld [vmem:[#allocation5 + $0x94] sm:$0xf0]  ;;  %v1139_v12 = vld [vmem:[#allocation5 + $0x14] sm:$0xf]  ;;  %v948_v16 = vor.u32 %v1140_v8, %v947_v7 }
  0x41   : > { %593 = vmatpush.bf16.msra.mxu3 %v1040_v50  ;;  %v949_v13 = vld [vmem:[#allocation5 + $0x18] sm:$0xf0]  ;;  %v1155_v14 = vld [vmem:[#allocation5 + $0x94] sm:$0xf]  ;;  %v939_v17 = vld [vmem:[#allocation5] sm:$0xf]  ;;  %v1012_v19 = vor.u32 %v1156_v11, %v1011_v9 }
  0x42   : > { %552 = vmatpush.bf16.msra.mxu0 %v964_v56  ;;  %v1013_v15 = vld [vmem:[#allocation5 + $0x98] sm:$0xf0]  ;;  %v1138_v18 = vld [vmem:[#allocation5 + $0x4] sm:$0xf0]  ;;  %v952_v20 = vor.u32 %v1139_v12, %v949_v13  ;;  %v1003_v21 = vld [vmem:[#allocation5 + $0x80] sm:$0xf] }
  0x43   : > { %566 = vmatpush.bf16.msra.mxu1 %v1028_v57  ;;  %v1154_v22 = vld [vmem:[#allocation5 + $0x84] sm:$0xf0]  ;;  %v1137_v23 = vld [vmem:[#allocation5 + $0x4] sm:$0xf]  ;;  %v1016_v24 = vor.u32 %v1155_v14, %v1013_v15  ;;  %v941_v25 = vld [vmem:[#allocation5 + $0x8] sm:$0xf0]  ;;  %v940_v28 = vor.u32 %v1138_v18, %v939_v17 }
  0x44   : > { %580 = vmatpush.bf16.msra.mxu2 %v968_v58  ;;  %v1153_v26 = vld [vmem:[#allocation5 + $0x84] sm:$0xf]  ;;  %v1005_v27 = vld [vmem:[#allocation5 + $0x88] sm:$0xf0]  ;;  %v931_v29 = vld [vmem:[%s1527_s14] sm:$0xf]  ;;  %v1004_v31 = vor.u32 %v1154_v22, %v1003_v21  ;;  %v944_v32 = vor.u32 %v1137_v23, %v941_v25 }
  0x45   : > { %594 = vmatpush.bf16.msra.mxu3 %v1032_v62  ;;  %v1136_v30 = vld [vmem:[%s1527_s14 + $0x4] sm:$0xf0]  ;;  %v1135_v33 = vld [vmem:[%s1527_s14 + $0x4] sm:$0xf]  ;;  %v933_v34 = vld [vmem:[%s1527_s14 + $0x8] sm:$0xf0]  ;;  %v1008_v35 = vor.u32 %v1153_v26, %v1005_v27 }
  0x46   : > { %553 = vmatpush.bf16.msra.mxu0 %v956_v4  ;;  %v1176_v36 = vld [vmem:[#allocation7 + $0x38] sm:$0xff]  ;;  %v932_v37 = vor.u32 %v1136_v30, %v931_v29  ;;  %v936_v39 = vor.u32 %v1135_v33, %v933_v34  ;;  %v1175_v40 = vld [vmem:[#allocation7 + $0x30] sm:$0xff]  ;;  %v1174_v42 = vld [vmem:[#allocation7 + $0x28] sm:$0xff]  ;;  %s782_s21 = sld [smem:[#allocation2]]  ;;  %s927_s22 = sshll.u32 %s913_s6, 1  ;;  %vm824_vm2 = vcmask 7168  }
  0x47   : > { %567 = vmatpush.bf16.msra.mxu1 %v1020_v5  ;;  %v1184_v38 = vld [vmem:[#allocation7 + $0x78] sm:$0xff]  ;;  %v1183_v41 = vld [vmem:[#allocation7 + $0x70] sm:$0xff]  ;;  %v1173_v43 = vld [vmem:[#allocation7 + $0x20] sm:$0xff]  ;;  %p333_p1 = scmp.lt.s32.totalorder %s927_s22, 5 }
  0x48   : > { %581 = vmatpush.bf16.msra.mxu2 %v960_v6  ;;  %v1182_v44 = vld [vmem:[#allocation7 + $0x68] sm:$0xff]  ;;  %v1172_v45 = vld [vmem:[#allocation7 + $0x18] sm:$0xff]  ;;  %v1181_v46 = vld [vmem:[#allocation7 + $0x60] sm:$0xff] }
  0x49   : > { %595 = vmatpush.bf16.msra.mxu3 %v1024_v10  ;;  %v1171_v47 = vld [vmem:[#allocation7 + $0x10] sm:$0xff]  ;;  %v1180_v48 = vld [vmem:[#allocation7 + $0x58] sm:$0xff]  ;;  %v1170_v49 = vld [vmem:[#allocation7 + $0x8] sm:$0xff]  ;;  %s1587_s22 = smov (!%p333_p1, %s927_s22), 5 }
  0x4a   : > { %554 = vmatpush.bf16.msra.mxu0 %v948_v16  ;;  %v1179_v50 = vld [vmem:[#allocation7 + $0x50] sm:$0xff]  ;;  %v1169_v51 = vld [vmem:[#allocation7] sm:$0xff]  ;;  %v1178_v52 = vld [vmem:[#allocation7 + $0x48] sm:$0xff]  ;;  %s928_s23 = sshll.u32 %s1587_s22, 3 }
  0x4b   : > { %568 = vmatpush.bf16.msra.mxu1 %v1012_v19  ;;  %v1177_v53 = vld [vmem:[#allocation7 + $0x40] sm:$0xff]  ;;  %s336_s6 = scalar_lea.vmem %s1577_s7, %s928_s23 }
  0x4c   : > { %582 = vmatpush.bf16.msra.mxu2 %v952_v20  ;;  %v372_v54 = vld [vmem:[%s1572_s2] sm:$0x3]  ;;  %v783_v29 = vstv %s782_s21 }
  0x4d   : > { %596 = vmatpush.bf16.msra.mxu3 %v1016_v24  ;;  %v374_v56 = vperm.slane %v372_v54, 0  ;;  %v375_v60 = vperm.slane %v372_v54, 1  ;;  %v1249_v16 = vld [vmem:[%s1574_s4] ss:$0 sm:$0xff] }
  0x4e   : > { %555 = vmatpush.bf16.msra.mxu0 %v940_v28  ;;  %v1250_v20 = vld [vmem:[%s1575_s5] ss:$0 sm:$0xff] }
  0x4f   : > { %569 = vmatpush.bf16.msra.mxu1 %v1004_v31 }
  0x50   : > { %583 = vmatpush.bf16.msra.mxu2 %v944_v32 }
  0x51   : > { %597 = vmatpush.bf16.msra.mxu3 %v1008_v35  ;;  %556 = vmatmul.bf16.vlgmr.msra.gmra.mxu0 %v932_v37 }
  0x52   : > { %742 = vmatpush.bf16.msrb.mxu0 %v1176_v36  ;;  %570 = vmatmul.bf16.vlgmr.msra.gmra.mxu1 %v936_v39 }
  0x53   : > { %756 = vmatpush.bf16.msrb.mxu1 %v1184_v38  ;;  %584 = vmatmul.bf16.vlgmr.msra.gmra.mxu2 %v932_v37 }
  0x54   : > { %598 = vmatmul.bf16.vlgmr.msra.gmra.mxu3 %v936_v39 }
  0x56   : > { %743 = vmatpush.bf16.msrb.mxu0 %v1175_v40 }
  0x57   : > { %757 = vmatpush.bf16.msrb.mxu1 %v1183_v41 }
  0x5a   : > { %744 = vmatpush.bf16.msrb.mxu0 %v1174_v42 }
  0x5b   : > { %758 = vmatpush.bf16.msrb.mxu1 %v1182_v44 }
  0x5e   : > { %745 = vmatpush.bf16.msrb.mxu0 %v1173_v43 }
  0x5f   : > { %759 = vmatpush.bf16.msrb.mxu1 %v1181_v46 }
  0x62   : > { %746 = vmatpush.bf16.msrb.mxu0 %v1172_v45 }
  0x63   : > { %760 = vmatpush.bf16.msrb.mxu1 %v1180_v48 }
  0x66   : > { %747 = vmatpush.bf16.msrb.mxu0 %v1171_v47 }
  0x67   : > { %761 = vmatpush.bf16.msrb.mxu1 %v1179_v50 }
  0x6a   : > { %748 = vmatpush.bf16.msrb.mxu0 %v1170_v49 }
  0x6b   : > { %762 = vmatpush.bf16.msrb.mxu1 %v1178_v52 }
  0x6e   : > { %749 = vmatpush.bf16.msrb.mxu0 %v1169_v51 }
  0x6f   : > { %763 = vmatpush.bf16.msrb.mxu1 %v1177_v53 }
  0xce   : > { %v557_v55 = vpop.f32.mrf.mxu0 }
  0xcf   : > { %v571_v57 = vpop.f32.mrf.mxu1  ;;  %v558_v58 = vadd.f32 %v557_v55, %v374_v56 }
  0xd1   : > { %v572_v63 = vadd.f32 %v571_v57, %v558_v58 }
  0xd3   : > { %v604_v4 = vmax.f32 %v572_v63, 0.0 }
  0xd6   : > { %v585_v59 = vpop.f32.mrf.mxu2  ;;  %v559_v62 = vpop.f32.mrf.mxu0 }
  0xd7   : > { %v599_v61 = vpop.f32.mrf.mxu3  ;;  %v560_v0 = vadd.f32 %v559_v62, %v374_v56  ;;  %v573_v1 = vpop.f32.mrf.mxu1  ;;  %v586_v3 = vadd.f32 %v585_v59, %v375_v60 }
  0xd9   : > { %v574_v2 = vadd.f32 %v573_v1, %v560_v0  ;;  %v600_v8 = vadd.f32 %v599_v61, %v586_v3 }
  0xdb   : > { %v606_v5 = vmax.f32 %v574_v2, 0.0  ;;  %v605_v12 = vmax.f32 %v600_v8, 0.0 }
  0xdd   : > { %v608_v6 = vpack.c.bf16 %v606_v5, %v604_v4 }
  0xde   : > { %v587_v7 = vpop.f32.mrf.mxu2 }
  0xdf   : > { %v588_v9 = vadd.f32 %v587_v7, %v375_v60  ;;  %v601_v10 = vpop.f32.mrf.mxu3  ;;  %750 = vmatmul.bf16.vlgmr.msrb.gmra.mxu0 %v608_v6 }
  0xe1   : > { %v602_v11 = vadd.f32 %v601_v10, %v588_v9 }
  0xe3   : > { %v607_v13 = vmax.f32 %v602_v11, 0.0 }
  0xe5   : > { %v609_v14 = vpack.c.bf16 %v607_v13, %v605_v12 }
  0xe7   : > { %764 = vmatmul.bf16.vlgmr.msrb.gmra.mxu1 %v609_v14 }
 0x15c   : > { %v751_v15 = vpop.f32.mrf.mxu0 }
 0x15d   : > { %v752_v17 = vadd.f32 %v1249_v16, %v751_v15 }
 0x164   : > { %v765_v18 = vpop.f32.mrf.mxu1  ;;  %v753_v22 = vpop.f32.mrf.mxu0 }
 0x165   : > { %v766_v19 = vadd.f32 %v765_v18, %v752_v17  ;;  %v754_v24 = vadd.f32 %v1249_v16, %v753_v22 }
 0x167   : > { %v770_v21 = vmax.f32 %v766_v19, 0.0 }
 0x169   : > { %v776_v23 = vmul.f32 %v1250_v20, %v770_v21 }
 0x16b   : > { %778 = vadd.xlane.f32.xlu0 %v776_v23 }
 0x16c   : > { %v767_v25 = vpop.f32.mrf.mxu1 }
 0x16d   : > { %v768_v26 = vadd.f32 %v767_v25, %v754_v24 }
 0x16f   : > { %v771_v27 = vmax.f32 %v768_v26, 0.0 }
 0x171   : > { %v777_v28 = vmul.f32 %v1250_v20, %v771_v27 }
 0x173   : > { %780 = vadd.xlane.f32.xlu0 %v777_v28 }
 0x1de   : > { %v779_v30 = vpop.xlane.xlu0 %778 }
 0x1df   : > { %v784_v31 = vadd.f32 %v783_v29, %v779_v30 }
 0x1e1   : > { %v1129_v32 = vmul.f32 -1.442695, %v784_v31 }
 0x1e3   : > { %1251 = vpow2.f32 %v1129_v32 }
 0x1e6   : > { %v781_v33 = vpop.xlane.xlu0 %780 }
 0x1e7   : > { %v785_v34 = vadd.f32 %v783_v29, %v781_v33 }
 0x1e9   : > { %v1252_v35 = vpop.eup %1251  ;;  %v1130_v36 = vmul.f32 -1.442695, %v785_v34 }
 0x1ea   : > { %v792_v37 = vadd.f32 1.0, %v1252_v35 }
 0x1eb   : > { %1253 = vpow2.f32 %v1130_v36 }
 0x1ec   : > { %1255 = vrcp.f32 %v792_v37  ;;  %v805_v43 = vand.u32 2147483648, %v792_v37  ;;  %v803_v45 = vand.u32 2147483647, %v792_v37  ;;  %vm799_vm1 = vweird.f32 %v792_v37 }
 0x1ee   : > { %v806_v48 = vor.u32 1.1754944e-38, %v805_v43  ;;  %vm804_vm4 = vcmp.eq.f32.partialorder %v803_v45, 8.507059e+37 }
 0x1f1   : > { %v1254_v38 = vpop.eup %1253 }
 0x1f2   : > { %v1256_v39 = vpop.eup %1255  ;;  %v793_v40 = vadd.f32 1.0, %v1254_v38 }
 0x1f3   : > { %v795_v41 = vmul.f32 %v1256_v39, %v792_v37  ;;  %vm800_vm0 = vweird.f32 %v1256_v39 }
 0x1f4   : > { %1257 = vrcp.f32 %v793_v40  ;;  %vm801_vm3 = vmor %vm799_vm1, %vm800_vm0  ;;  %v820_v53 = vand.u32 2147483648, %v793_v40  ;;  %v818_v55 = vand.u32 2147483647, %v793_v40  ;;  %vm814_vm6 = vweird.f32 %v793_v40 }
 0x1f5   : > { %v796_v42 = vsub.f32 1.0, %v795_v41 }
 0x1f6   : > { %v821_v57 = vor.u32 1.1754944e-38, %v820_v53  ;;  %vm819_vm8 = vcmp.eq.f32.partialorder %v818_v55, 8.507059e+37 }
 0x1f7   : > { %v797_v44 = vmul.f32 %v1256_v39, %v796_v42 }
 0x1f9   : > { %v798_v46 = vadd.f32 %v1256_v39, %v797_v44 }
 0x1fa   : > { %v1258_v47 = vpop.eup %1257 }
 0x1fb   : > { %v802_v49 = vsel %vm801_vm3, %v1256_v39, %v798_v46  ;;  %v810_v50 = vmul.f32 %v1258_v47, %v793_v40  ;;  %vm815_vm5 = vweird.f32 %v1258_v47 }
 0x1fc   : > { %v807_v51 = vsel %vm804_vm4, %v806_v48, %v802_v49  ;;  %vm816_vm7 = vmor %vm814_vm6, %vm815_vm5 }
 0x1fd   : > { %825 = vst.msk [vmem:[%s336_s6] sm:$0xff] %vm824_vm2, %v807_v51  ;;  %v811_v52 = vsub.f32 1.0, %v810_v50 }
 0x1ff   : > { %v812_v54 = vmul.f32 %v1258_v47, %v811_v52 }
 0x201   : > { %v813_v56 = vadd.f32 %v1258_v47, %v812_v54 }
 0x203   : > { %v817_v58 = vsel %vm816_vm7, %v1258_v47, %v813_v56 }
 0x204   : > { %v822_v59 = vsel %vm819_vm8, %v821_v57, %v817_v58 }
 0x205   : > { %826 = vst.msk [vmem:[%s336_s6 + $0x8] sm:$0xff] %vm824_vm2, %v822_v59 }
 0x206 PF: > { %p19_p4 = scmp.ge.s32.totalorder %s1490_s24, 5   ;;  %s1582_s26 = smov %s1379_s27 }
 0x207   : > { %s1583_s27 = smov %s1383_s28  ;;  %s1584_s28 = smov %s1499_s9 }
 0x208   : > { %s1585_s29 = smov %s1490_s24  ;;  %21 = sbr.rel (!%p19_p4) target bundleno = 6 (0x6), region = 96 }
 0x20d   :  { %849 = vsyncpa [#allocation4], 1 }
 0x20e   :  { %851 = vsyncpa [#allocation4 + $0x1], 1 }
 0x20f   :  { %852 = vsyncpa [#allocation6], 1 }

</bundles_post_ra>
